<compile_context>
chip_gen: v7x
topology: tpu7x:2x2x1
jax: 0.10.0
libtpu: 0.0.40
codegen_flags: <defaults>
</compile_context>

<pallas_src>
import functools

import numpy as np

import jax
import jax.numpy as jnp
from jax import lax
from jax.experimental import pallas as pl
from jax.experimental.pallas import tpu as pltpu


# -----------------------------------------------------------------------------
# Kernels. One grid step handles `rt` rows of the (Co*H) axis for one batch n.
#   x_ref: (1, b*b, rt, W)   the b*b source planes restricted to rt rows
#   o_ref: (1, rt, b*b*W)    lane-dense, fully contiguous output rows
# -----------------------------------------------------------------------------

def _d2s_strided_kernel(x_ref, o_ref, *, b):
    """Direct scatter: b*b stores at lane stride b (bit-exact, zero FLOPs)."""
    w = x_ref.shape[3]
    wb = w * b
    for i in range(b):
        for j in range(b):
            o_ref[0, :, pl.ds(i * wb + j, w, stride=b)] = x_ref[0, i * b + j]


def _d2s_stack_kernel(x_ref, o_ref, *, b):
    """In-register lane interleave (bit-exact, zero FLOPs, XLU/VPU only)."""
    rt, w = x_ref.shape[2], x_ref.shape[3]
    wb = w * b
    for i in range(b):
        cols = [x_ref[0, i * b + j] for j in range(b)]
        o_ref[0, :, i * wb:(i + 1) * wb] = (
            jnp.stack(cols, axis=-1).reshape(rt, wb))


def _d2s_matmul_kernel(t_ref, x_ref, o_ref, *, b, precision):
    """One-hot selection on the MXU (fallback path).

    t_ref: (b, W, b*W) exact 0/1 matrices.  Per i-group the b contributions
    have disjoint one-hot lane support, so the f32 adds are exact; the result
    is written straight to its contiguous (rt, b*W) output slice.
    """
    w = x_ref.shape[3]
    wb = w * b
    cdt = t_ref.dtype
    for i in range(b):
        acc = None
        for j in range(b):
            term = jnp.dot(
                x_ref[0, i * b + j].astype(cdt),
                t_ref[j],
                preferred_element_type=jnp.float32,
                precision=precision,
            )
            acc = term if acc is None else acc + term
        o_ref[0, :, i * wb:(i + 1) * wb] = acc.astype(o_ref.dtype)


# -----------------------------------------------------------------------------
# Helpers
# -----------------------------------------------------------------------------

def _interleave_matrices(b, w, dtype):
    """T[j, ww, ww*b + j] = 1  — b matrices of shape (W, b*W)."""
    t = np.zeros((b, w, w * b), dtype=np.float32)
    ws = np.arange(w)
    for j in range(b):
        t[j, ws, ws * b + j] = 1.0
    return jnp.asarray(t, dtype=dtype)


def _sublane_granule(dtype):
    itemsize = jnp.dtype(dtype).itemsize
    return int(max(8, 32 // max(1, itemsize)))   # 8 f32, 16 bf16, 32 int8


def _vmem_capacity_bytes():
    try:
        cap = int(pltpu.get_tpu_info().vmem_capacity_bytes)
        if cap >= (32 << 20):
            return cap
    except Exception:
        pass
    return 64 << 20   # conservative default: v7x per-TensorCore VMEM


def _d2s_pallas(x4, b, rt, path, vmem_limit):
    """pallas_call for x4 (n, b*b, Co*H, W) -> out3 (n, Co*H, b*b*W)."""
    n, s, rows, w = (int(d) for d in x4.shape)
    lanes = s * w
    grid = (n, pl.cdiv(rows, rt))
    x_spec = pl.BlockSpec((1, s, rt, w), lambda ni, ti: (ni, 0, ti, 0))
    o_spec = pl.BlockSpec((1, rt, lanes), lambda ni, ti: (ni, ti, 0))
    out_shape = jax.ShapeDtypeStruct((n, rows, lanes), x4.dtype)
    cparams = pltpu.CompilerParams(
        dimension_semantics=("parallel", "parallel"),
        vmem_limit_bytes=int(vmem_limit),
    )

    if path == "matmul":
        cdt = jnp.bfloat16 if x4.dtype == jnp.bfloat16 else jnp.float32
        prec = (lax.Precision.DEFAULT if cdt == jnp.bfloat16
                else lax.Precision.HIGHEST)
        t_mats = _interleave_matrices(b, w, cdt)
        t_spec = pl.BlockSpec((b, w, w * b), lambda ni, ti: (0, 0, 0))
        kernel = functools.partial(_d2s_matmul_kernel, b=b, precision=prec)
        return pl.pallas_call(
            kernel, out_shape=out_shape, grid=grid,
            in_specs=[t_spec, x_spec], out_specs=o_spec,
            compiler_params=cparams,
        )(t_mats, x4)

    kern_fn = _d2s_strided_kernel if path == "strided" else _d2s_stack_kernel
    kernel = functools.partial(kern_fn, b=b)
    return pl.pallas_call(
        kernel, out_shape=out_shape, grid=grid,
        in_specs=[x_spec], out_specs=o_spec,
        compiler_params=cparams,
    )(x4)


@functools.lru_cache(maxsize=None)
def _pick_path(b, w, dtype_str):
    """Probe the exact zero-FLOP interleave paths on a tiny problem; fall back
    to the always-lowerable one-hot-matmul path if the Mosaic build rejects
    (or miscompiles) them.  The probe checks numerics bit-exactly."""
    dtype = jnp.dtype(dtype_str)
    s = b * b
    sub = _sublane_granule(dtype)
    rows = 2 * sub
    data = (np.arange(s * rows * w, dtype=np.float32) % 251.0) - 125.0
    x4 = jnp.asarray(data.reshape(1, s, rows, w)).astype(dtype)
    ref = jnp.transpose(
        x4.reshape(1, b, b, rows, w), (0, 3, 1, 4, 2)).reshape(1, rows, s * w)
    for path in ("strided", "stack"):
        try:
            out = jax.block_until_ready(
                _d2s_pallas(x4, b, rt=sub, path=path, vmem_limit=32 << 20))
            if bool(jnp.array_equal(out, ref)):
                return path
        except Exception:
            pass   # this Mosaic build does not lower this interleave form
    return "matmul"


# -----------------------------------------------------------------------------
# Public wrapper
# -----------------------------------------------------------------------------

def depth_to_space(x, block_size):
    """Pallas DepthToSpace (DCR).  Accepts (*outer, C, H, W); returns
    (*outer, C // block_size**2, H*block_size, W*block_size)."""
    b = int(block_size)
    if x.ndim < 3:
        raise ValueError("Expecting a channels-first (*CHW) tensor of >= 3 dims")
    shape = tuple(int(d) for d in x.shape)
    *outer, c, h, w = shape
    s = b * b
    if c % s != 0:
        raise ValueError(f"C={c} must be divisible by block_size^2={s}")
    if b == 1:
        return x                       # identity
    co = c // s
    n = 1
    for d in outer:
        n *= d
    rows, lanes = co * h, s * w        # kernel sublane / lane extents
    hb, wb = h * b, w * b

    # Free reshape: x4[n, i*b+j, co*H + hh, ww] == x[n, (i*b+j)*Co + co, hh, ww]
    x4 = x.reshape(n, s, rows, w)

    dtype = jnp.dtype(x.dtype)
    itemsize = dtype.itemsize
    sub = _sublane_granule(dtype)
    path = _pick_path(b, w, str(dtype))

    # ---- VMEM budget (dtype- and padding-aware) ------------------------------
    lane_pad = lambda k: ((k + 127) // 128) * 128
    # Per row of the rt axis: double-buffered input planes + output slab, plus
    # one live f32 (rt, b*W) temporary (matmul acc / interleave staging).
    per_row = 2 * (s * lane_pad(w) + lane_pad(lanes)) * itemsize
    per_row += 4 * lane_pad(wb)
    t_bytes = 0
    if path == "matmul":
        t_item = 2 if dtype == jnp.bfloat16 else 4
        t_bytes = 2 * b * max(w, 8) * lane_pad(wb) * t_item   # double-buffered

    cap = _vmem_capacity_bytes()
    budget = min(max(cap // 4, 8 << 20), 40 << 20)   # ~16 MiB v7x, ~32 MiB v5e/v6e
    avail = max(budget - t_bytes, per_row * sub)
    rt = max(sub, (int(avail // per_row) // sub) * sub)
    if n == 1 and rows > sub:
        # keep >= 2 row tiles so both v7x TensorCores get work at batch 1
        half = (((rows + 1) // 2 + sub - 1) // sub) * sub
        rt = min(rt, half)
    rt = min(rt, rows)
    if rt < rows:
        # prefer an rt that divides rows (avoids a ragged, masked trailing tile)
        for cand in range(rt, max(sub, rt // 2) - 1, -sub):
            if rows % cand == 0:
                rt = cand
                break

    need = rt * per_row + t_bytes + (8 << 20)        # + Mosaic scratch headroom
    vmem_limit = int(min(max(need, 16 << 20), cap - (8 << 20)))

    out3 = _d2s_pallas(x4, b, rt=rt, path=path, vmem_limit=vmem_limit)

    # Free reshape back to the true NCHW output layout.
    return out3.reshape(*outer, co, hb, wb)


def _depth_to_space_ref(x, b):
    """Pure-JAX reference mirroring the PyTorch implementation."""
    *outer, c, h, w = x.shape
    co = c // (b * b)
    y = x.reshape(-1, b, b, co, h, w)
    y = jnp.transpose(y, (0, 3, 4, 1, 5, 2))
    return y.reshape(*outer, co, h * b, w * b)


if __name__ == "__main__":
    block_size = 2
    k1, k2 = jax.random.split(jax.random.PRNGKey(0))

    # Case 1: module-scale example (N=2, C=4, H=W=16) -> (2, 1, 32, 32)
    x = jax.random.normal(k1, (2, 4, 16, 16), dtype=jnp.float32)
    out = jax.block_until_ready(depth_to_space(x, block_size))
    ref = _depth_to_space_ref(x, block_size)
    assert out.shape == ref.shape == (2, 1, 32, 32), out.shape
    assert out.dtype == x.dtype
    assert jnp.allclose(out, ref, atol=1e-6, rtol=1e-6), "mismatch vs reference"

    # Case 2: Co > 1 (N=2, C=8, H=W=16) -> (2, 2, 32, 32)
    x2 = jax.random.normal(k2, (2, 8, 16, 16), dtype=jnp.float32)
    out2 = jax.block_until_ready(depth_to_space(x2, block_size))
    ref2 = _depth_to_space_ref(x2, block_size)
    assert out2.shape == ref2.shape == (2, 2, 32, 32), out2.shape
    assert jnp.allclose(out2, ref2, atol=1e-6, rtol=1e-6), "mismatch vs ref (Co>1)"

    print("KERNEL_OK")
</pallas_src>

<mosaic_0001>
module attributes {stable_mosaic.version = 11 : i64} {
  func.func @_d2s_strided_kernel(%arg0: i32, %arg1: i32, %arg2: memref<1x4x8x16xf32, #tpu.memory_space<vmem>>, %arg3: memref<1x8x64xf32, #tpu.memory_space<vmem>>) attributes {dimension_semantics = [#tpu.dimension_semantics<parallel>, #tpu.dimension_semantics<parallel>], iteration_bounds = array<i64: 1, 2>, scalar_prefetch = 0 : i64, scratch_operands = 0 : i64, tpu.core_type = #tpu.core_type<tc>, window_params = [{transform_indices = @transform_0, window_bounds = array<i64: 1, 4, 8, 16>}, {transform_indices = @transform_1, window_bounds = array<i64: 1, 8, 64>}]} {
    %c0 = arith.constant 0 : index
    %c0_0 = arith.constant 0 : index
    %c0_1 = arith.constant 0 : index
    %c0_2 = arith.constant 0 : index
    %0 = vector.load %arg2[%c0, %c0_0, %c0_1, %c0_2] : memref<1x4x8x16xf32, #tpu.memory_space<vmem>>, vector<1x1x8x16xf32>
    %1 = vector.shape_cast %0 : vector<1x1x8x16xf32> to vector<8x16xf32>
    %c0_3 = arith.constant 0 : index
    %c0_4 = arith.constant 0 : index
    %c0_5 = arith.constant 0 : index
    %2 = tpu.strided_load %arg3[%c0_3, %c0_4, %c0_5] {strides = array<i32: 1, 1, 2>} : memref<1x8x64xf32, #tpu.memory_space<vmem>>, vector<1x8x16xf32>
    %3 = vector.shape_cast %2 : vector<1x8x16xf32> to vector<8x16xf32>
    %4 = vector.shape_cast %1 : vector<8x16xf32> to vector<1x8x16xf32>
    tpu.strided_store %arg3[%c0_3, %c0_4, %c0_5], %4 {strides = array<i32: 1, 1, 2>} : memref<1x8x64xf32, #tpu.memory_space<vmem>>, vector<1x8x16xf32>
    %c0_6 = arith.constant 0 : index
    %c1 = arith.constant 1 : index
    %c0_7 = arith.constant 0 : index
    %c0_8 = arith.constant 0 : index
    %5 = vector.load %arg2[%c0_6, %c1, %c0_7, %c0_8] : memref<1x4x8x16xf32, #tpu.memory_space<vmem>>, vector<1x1x8x16xf32>
    %6 = vector.shape_cast %5 : vector<1x1x8x16xf32> to vector<8x16xf32>
    %c0_9 = arith.constant 0 : index
    %c0_10 = arith.constant 0 : index
    %c1_11 = arith.constant 1 : index
    %7 = tpu.strided_load %arg3[%c0_9, %c0_10, %c1_11] {strides = array<i32: 1, 1, 2>} : memref<1x8x64xf32, #tpu.memory_space<vmem>>, vector<1x8x16xf32>
    %8 = vector.shape_cast %7 : vector<1x8x16xf32> to vector<8x16xf32>
    %9 = vector.shape_cast %6 : vector<8x16xf32> to vector<1x8x16xf32>
    tpu.strided_store %arg3[%c0_9, %c0_10, %c1_11], %9 {strides = array<i32: 1, 1, 2>} : memref<1x8x64xf32, #tpu.memory_space<vmem>>, vector<1x8x16xf32>
    %c0_12 = arith.constant 0 : index
    %c2 = arith.constant 2 : index
    %c0_13 = arith.constant 0 : index
    %c0_14 = arith.constant 0 : index
    %10 = vector.load %arg2[%c0_12, %c2, %c0_13, %c0_14] : memref<1x4x8x16xf32, #tpu.memory_space<vmem>>, vector<1x1x8x16xf32>
    %11 = vector.shape_cast %10 : vector<1x1x8x16xf32> to vector<8x16xf32>
    %c0_15 = arith.constant 0 : index
    %c0_16 = arith.constant 0 : index
    %c32 = arith.constant 32 : index
    %12 = tpu.strided_load %arg3[%c0_15, %c0_16, %c32] {strides = array<i32: 1, 1, 2>} : memref<1x8x64xf32, #tpu.memory_space<vmem>>, vector<1x8x16xf32>
    %13 = vector.shape_cast %12 : vector<1x8x16xf32> to vector<8x16xf32>
    %14 = vector.shape_cast %11 : vector<8x16xf32> to vector<1x8x16xf32>
    tpu.strided_store %arg3[%c0_15, %c0_16, %c32], %14 {strides = array<i32: 1, 1, 2>} : memref<1x8x64xf32, #tpu.memory_space<vmem>>, vector<1x8x16xf32>
    %c0_17 = arith.constant 0 : index
    %c3 = arith.constant 3 : index
    %c0_18 = arith.constant 0 : index
    %c0_19 = arith.constant 0 : index
    %15 = vector.load %arg2[%c0_17, %c3, %c0_18, %c0_19] : memref<1x4x8x16xf32, #tpu.memory_space<vmem>>, vector<1x1x8x16xf32>
    %16 = vector.shape_cast %15 : vector<1x1x8x16xf32> to vector<8x16xf32>
    %c0_20 = arith.constant 0 : index
    %c0_21 = arith.constant 0 : index
    %c33 = arith.constant 33 : index
    %17 = tpu.strided_load %arg3[%c0_20, %c0_21, %c33] {strides = array<i32: 1, 1, 2>} : memref<1x8x64xf32, #tpu.memory_space<vmem>>, vector<1x8x16xf32>
    %18 = vector.shape_cast %17 : vector<1x8x16xf32> to vector<8x16xf32>
    %19 = vector.shape_cast %16 : vector<8x16xf32> to vector<1x8x16xf32>
    tpu.strided_store %arg3[%c0_20, %c0_21, %c33], %19 {strides = array<i32: 1, 1, 2>} : memref<1x8x64xf32, #tpu.memory_space<vmem>>, vector<1x8x16xf32>
    return
  }
  func.func @transform_0(%arg0: i32, %arg1: i32) -> (i32, i32, i32, i32) {
    %c0_i32 = arith.constant 0 : i32
    %c0_i32_0 = arith.constant 0 : i32
    %c0_i32_1 = arith.constant 0 : i32
    return %arg0, %c0_i32, %arg1, %c0_i32_0 : i32, i32, i32, i32
  }
  func.func @transform_1(%arg0: i32, %arg1: i32) -> (i32, i32, i32) {
    %c0_i32 = arith.constant 0 : i32
    %c0_i32_0 = arith.constant 0 : i32
    return %arg0, %arg1, %c0_i32 : i32, i32, i32
  }
}

module attributes {stable_mosaic.version = 11 : i64} {
  func.func @_d2s_stack_kernel(%arg0: i32, %arg1: i32, %arg2: memref<1x4x8x16xf32, #tpu.memory_space<vmem>>, %arg3: memref<1x8x64xf32, #tpu.memory_space<vmem>>) attributes {dimension_semantics = [#tpu.dimension_semantics<parallel>, #tpu.dimension_semantics<parallel>], iteration_bounds = array<i64: 1, 2>, scalar_prefetch = 0 : i64, scratch_operands = 0 : i64, tpu.core_type = #tpu.core_type<tc>, window_params = [{transform_indices = @transform_0, window_bounds = array<i64: 1, 4, 8, 16>}, {transform_indices = @transform_1, window_bounds = array<i64: 1, 8, 64>}]} {
    %c0 = arith.constant 0 : index
    %c0_0 = arith.constant 0 : index
    %c0_1 = arith.constant 0 : index
    %c0_2 = arith.constant 0 : index
    %0 = vector.load %arg2[%c0, %c0_0, %c0_1, %c0_2] : memref<1x4x8x16xf32, #tpu.memory_space<vmem>>, vector<1x1x8x16xf32>
    %1 = vector.shape_cast %0 : vector<1x1x8x16xf32> to vector<8x16xf32>
    %c0_3 = arith.constant 0 : index
    %c1 = arith.constant 1 : index
    %c0_4 = arith.constant 0 : index
    %c0_5 = arith.constant 0 : index
    %2 = vector.load %arg2[%c0_3, %c1, %c0_4, %c0_5] : memref<1x4x8x16xf32, #tpu.memory_space<vmem>>, vector<1x1x8x16xf32>
    %3 = vector.shape_cast %2 : vector<1x1x8x16xf32> to vector<8x16xf32>
    %4 = vector.shape_cast %1 : vector<8x16xf32> to vector<8x16x1xf32>
    %5 = vector.shape_cast %3 : vector<8x16xf32> to vector<8x16x1xf32>
    %6 = tpu.concatenate %4, %5 in 2 : vector<8x16x1xf32>, vector<8x16x1xf32> -> vector<8x16x2xf32>
    %7 = vector.shape_cast %6 : vector<8x16x2xf32> to vector<8x32xf32>
    %c0_6 = arith.constant 0 : index
    %c0_7 = arith.constant 0 : index
    %c0_8 = arith.constant 0 : index
    %8 = vector.load %arg3[%c0_6, %c0_7, %c0_8] : memref<1x8x64xf32, #tpu.memory_space<vmem>>, vector<1x8x32xf32>
    %9 = vector.shape_cast %8 : vector<1x8x32xf32> to vector<8x32xf32>
    %10 = vector.shape_cast %7 : vector<8x32xf32> to vector<1x8x32xf32>
    tpu.vector_store %arg3[%c0_6, %c0_7, %c0_8], %10 {strides = array<i32>} : memref<1x8x64xf32, #tpu.memory_space<vmem>>, vector<1x8x32xf32>,
    %c0_9 = arith.constant 0 : index
    %c2 = arith.constant 2 : index
    %c0_10 = arith.constant 0 : index
    %c0_11 = arith.constant 0 : index
    %11 = vector.load %arg2[%c0_9, %c2, %c0_10, %c0_11] : memref<1x4x8x16xf32, #tpu.memory_space<vmem>>, vector<1x1x8x16xf32>
    %12 = vector.shape_cast %11 : vector<1x1x8x16xf32> to vector<8x16xf32>
    %c0_12 = arith.constant 0 : index
    %c3 = arith.constant 3 : index
    %c0_13 = arith.constant 0 : index
    %c0_14 = arith.constant 0 : index
    %13 = vector.load %arg2[%c0_12, %c3, %c0_13, %c0_14] : memref<1x4x8x16xf32, #tpu.memory_space<vmem>>, vector<1x1x8x16xf32>
    %14 = vector.shape_cast %13 : vector<1x1x8x16xf32> to vector<8x16xf32>
    %15 = vector.shape_cast %12 : vector<8x16xf32> to vector<8x16x1xf32>
    %16 = vector.shape_cast %14 : vector<8x16xf32> to vector<8x16x1xf32>
    %17 = tpu.concatenate %15, %16 in 2 : vector<8x16x1xf32>, vector<8x16x1xf32> -> vector<8x16x2xf32>
    %18 = vector.shape_cast %17 : vector<8x16x2xf32> to vector<8x32xf32>
    %c0_15 = arith.constant 0 : index
    %c0_16 = arith.constant 0 : index
    %c32 = arith.constant 32 : index
    %19 = vector.load %arg3[%c0_15, %c0_16, %c32] : memref<1x8x64xf32, #tpu.memory_space<vmem>>, vector<1x8x32xf32>
    %20 = vector.shape_cast %19 : vector<1x8x32xf32> to vector<8x32xf32>
    %21 = vector.shape_cast %18 : vector<8x32xf32> to vector<1x8x32xf32>
    tpu.vector_store %arg3[%c0_15, %c0_16, %c32], %21 {strides = array<i32>} : memref<1x8x64xf32, #tpu.memory_space<vmem>>, vector<1x8x32xf32>,
    return
  }
  func.func @transform_0(%arg0: i32, %arg1: i32) -> (i32, i32, i32, i32) {
    %c0_i32 = arith.constant 0 : i32
    %c0_i32_0 = arith.constant 0 : i32
    %c0_i32_1 = arith.constant 0 : i32
    return %arg0, %c0_i32, %arg1, %c0_i32_0 : i32, i32, i32, i32
  }
  func.func @transform_1(%arg0: i32, %arg1: i32) -> (i32, i32, i32) {
    %c0_i32 = arith.constant 0 : i32
    %c0_i32_0 = arith.constant 0 : i32
    return %arg0, %arg1, %c0_i32 : i32, i32, i32
  }
}

module attributes {stable_mosaic.version = 11 : i64} {
  func.func @_d2s_matmul_kernel(%arg0: i32, %arg1: i32, %arg2: memref<2x16x32xf32, #tpu.memory_space<vmem>>, %arg3: memref<1x4x16x16xf32, #tpu.memory_space<vmem>>, %arg4: memref<1x16x64xf32, #tpu.memory_space<vmem>>) attributes {dimension_semantics = [#tpu.dimension_semantics<parallel>, #tpu.dimension_semantics<parallel>], iteration_bounds = array<i64: 2, 1>, scalar_prefetch = 0 : i64, scratch_operands = 0 : i64, tpu.core_type = #tpu.core_type<tc>, window_params = [{pipeline_mode = #tpu.pipeline_mode<synchronous>, transform_indices = @transform_0, window_bounds = array<i64: 2, 16, 32>}, {transform_indices = @transform_1, window_bounds = array<i64: 1, 4, 16, 16>}, {transform_indices = @transform_2, window_bounds = array<i64: 1, 16, 64>}]} {
    %c0 = arith.constant 0 : index
    %c0_0 = arith.constant 0 : index
    %c0_1 = arith.constant 0 : index
    %c0_2 = arith.constant 0 : index
    %0 = vector.load %arg3[%c0, %c0_0, %c0_1, %c0_2] : memref<1x4x16x16xf32, #tpu.memory_space<vmem>>, vector<1x1x16x16xf32>
    %1 = vector.shape_cast %0 : vector<1x1x16x16xf32> to vector<16x16xf32>
    %c0_3 = arith.constant 0 : index
    %c0_4 = arith.constant 0 : index
    %c0_5 = arith.constant 0 : index
    %2 = vector.load %arg2[%c0_3, %c0_4, %c0_5] : memref<2x16x32xf32, #tpu.memory_space<vmem>>, vector<1x16x32xf32>
    %3 = vector.shape_cast %2 : vector<1x16x32xf32> to vector<16x32xf32>
    %cst = arith.constant dense<0.000000e+00> : vector<16x32xf32>
    %4 = tpu.matmul %1, %3, %cst {dimension_numbers = #tpu.dot_dimension_numbers<[1], [0], [0], [1], [0, 0, 1, 1], [], []>, precision = #tpu.contract_precision<fp32>} : vector<16x16xf32>, vector<16x32xf32>, vector<16x32xf32> -> vector<16x32xf32>
    %c0_6 = arith.constant 0 : index
    %c1 = arith.constant 1 : index
    %c0_7 = arith.constant 0 : index
    %c0_8 = arith.constant 0 : index
    %5 = vector.load %arg3[%c0_6, %c1, %c0_7, %c0_8] : memref<1x4x16x16xf32, #tpu.memory_space<vmem>>, vector<1x1x16x16xf32>
    %6 = vector.shape_cast %5 : vector<1x1x16x16xf32> to vector<16x16xf32>
    %c1_9 = arith.constant 1 : index
    %c0_10 = arith.constant 0 : index
    %c0_11 = arith.constant 0 : index
    %7 = vector.load %arg2[%c1_9, %c0_10, %c0_11] : memref<2x16x32xf32, #tpu.memory_space<vmem>>, vector<1x16x32xf32>
    %8 = vector.shape_cast %7 : vector<1x16x32xf32> to vector<16x32xf32>
    %cst_12 = arith.constant dense<0.000000e+00> : vector<16x32xf32>
    %9 = tpu.matmul %6, %8, %cst_12 {dimension_numbers = #tpu.dot_dimension_numbers<[1], [0], [0], [1], [0, 0, 1, 1], [], []>, precision = #tpu.contract_precision<fp32>} : vector<16x16xf32>, vector<16x32xf32>, vector<16x32xf32> -> vector<16x32xf32>
    %10 = arith.addf %4, %9 : vector<16x32xf32>
    %c0_13 = arith.constant 0 : index
    %c0_14 = arith.constant 0 : index
    %c0_15 = arith.constant 0 : index
    %11 = vector.load %arg4[%c0_13, %c0_14, %c0_15] : memref<1x16x64xf32, #tpu.memory_space<vmem>>, vector<1x16x32xf32>
    %12 = vector.shape_cast %11 : vector<1x16x32xf32> to vector<16x32xf32>
    %13 = vector.shape_cast %10 : vector<16x32xf32> to vector<1x16x32xf32>
    tpu.vector_store %arg4[%c0_13, %c0_14, %c0_15], %13 {strides = array<i32>} : memref<1x16x64xf32, #tpu.memory_space<vmem>>, vector<1x16x32xf32>,
    %c0_16 = arith.constant 0 : index
    %c2 = arith.constant 2 : index
    %c0_17 = arith.constant 0 : index
    %c0_18 = arith.constant 0 : index
    %14 = vector.load %arg3[%c0_16, %c2, %c0_17, %c0_18] : memref<1x4x16x16xf32, #tpu.memory_space<vmem>>, vector<1x1x16x16xf32>
    %15 = vector.shape_cast %14 : vector<1x1x16x16xf32> to vector<16x16xf32>
    %c0_19 = arith.constant 0 : index
    %c0_20 = arith.constant 0 : index
    %c0_21 = arith.constant 0 : index
    %16 = vector.load %arg2[%c0_19, %c0_20, %c0_21] : memref<2x16x32xf32, #tpu.memory_space<vmem>>, vector<1x16x32xf32>
    %17 = vector.shape_cast %16 : vector<1x16x32xf32> to vector<16x32xf32>
    %cst_22 = arith.constant dense<0.000000e+00> : vector<16x32xf32>
    %18 = tpu.matmul %15, %17, %cst_22 {dimension_numbers = #tpu.dot_dimension_numbers<[1], [0], [0], [1], [0, 0, 1, 1], [], []>, precision = #tpu.contract_precision<fp32>} : vector<16x16xf32>, vector<16x32xf32>, vector<16x32xf32> -> vector<16x32xf32>
    %c0_23 = arith.constant 0 : index
    %c3 = arith.constant 3 : index
    %c0_24 = arith.constant 0 : index
    %c0_25 = arith.constant 0 : index
    %19 = vector.load %arg3[%c0_23, %c3, %c0_24, %c0_25] : memref<1x4x16x16xf32, #tpu.memory_space<vmem>>, vector<1x1x16x16xf32>
    %20 = vector.shape_cast %19 : vector<1x1x16x16xf32> to vector<16x16xf32>
    %c1_26 = arith.constant 1 : index
    %c0_27 = arith.constant 0 : index
    %c0_28 = arith.constant 0 : index
    %21 = vector.load %arg2[%c1_26, %c0_27, %c0_28] : memref<2x16x32xf32, #tpu.memory_space<vmem>>, vector<1x16x32xf32>
    %22 = vector.shape_cast %21 : vector<1x16x32xf32> to vector<16x32xf32>
    %cst_29 = arith.constant dense<0.000000e+00> : vector<16x32xf32>
    %23 = tpu.matmul %20, %22, %cst_29 {dimension_numbers = #tpu.dot_dimension_numbers<[1], [0], [0], [1], [0, 0, 1, 1], [], []>, precision = #tpu.contract_precision<fp32>} : vector<16x16xf32>, vector<16x32xf32>, vector<16x32xf32> -> vector<16x32xf32>
    %24 = arith.addf %18, %23 : vector<16x32xf32>
    %c0_30 = arith.constant 0 : index
    %c0_31 = arith.constant 0 : index
    %c32 = arith.constant 32 : index
    %25 = vector.load %arg4[%c0_30, %c0_31, %c32] : memref<1x16x64xf32, #tpu.memory_space<vmem>>, vector<1x16x32xf32>
    %26 = vector.shape_cast %25 : vector<1x16x32xf32> to vector<16x32xf32>
    %27 = vector.shape_cast %24 : vector<16x32xf32> to vector<1x16x32xf32>
    tpu.vector_store %arg4[%c0_30, %c0_31, %c32], %27 {strides = array<i32>} : memref<1x16x64xf32, #tpu.memory_space<vmem>>, vector<1x16x32xf32>,
    return
  }
  func.func @transform_0(%arg0: i32, %arg1: i32) -> (i32, i32, i32) {
    %c0_i32 = arith.constant 0 : i32
    %c0_i32_0 = arith.constant 0 : i32
    %c0_i32_1 = arith.constant 0 : i32
    %c0_i32_2 = arith.constant 0 : i32
    return %c0_i32, %c0_i32_0, %c0_i32_1 : i32, i32, i32
  }
  func.func @transform_1(%arg0: i32, %arg1: i32) -> (i32, i32, i32, i32) {
    %c0_i32 = arith.constant 0 : i32
    %c0_i32_0 = arith.constant 0 : i32
    %c0_i32_1 = arith.constant 0 : i32
    return %arg0, %c0_i32, %arg1, %c0_i32_0 : i32, i32, i32, i32
  }
  func.func @transform_2(%arg0: i32, %arg1: i32) -> (i32, i32, i32) {
    %c0_i32 = arith.constant 0 : i32
    %c0_i32_0 = arith.constant 0 : i32
    return %arg0, %arg1, %c0_i32 : i32, i32, i32
  }
}

</mosaic_0001>

<bundles_post_ra>
// kernel: tpu_custom_call.1
= control target key start
LH: loop header
LB: loop body
LE: loop exit
PB: predicated region body
PF: predicated region fallthrough
CT: control target
= control target key end

     0   :  { %6 = vsyncpa [#allocation3], 0  ;;  %s2025_s0 = inlined_call_operand.hbm [shape: f32[1,4,16,16], index: 0, kind: input, shape index: {}]   ;;  %s2026_s1 = inlined_call_operand.hbm [shape: f32[1,16,64], index: 1, kind: output, shape index: {}]  }
   0x1   :  { %8 = vsyncpa [#allocation3 + $0x1], 0 }
   0x2   :  { %9 = vsyncpa [#allocation4], 0 }
   0x3   :  { %11 = vsyncpa [#allocation4 + $0x1], 0  ;;  %s1605_s6 = smov 0   ;;  %s1607_s7 = smov 0  }
   0x4   :  { %s1609_s8 = smov 0   ;;  %s1611_s9 = smov 0  }
   0x5   :  { %s1613_s10 = smov 0   ;;  %s1615_s11 = smov 0  }
   0x6 LB: > { %s1359_s12 = sadd.s32 4294967295, %s1570_s11   ;;  %s1360_s13 = sadd.s32 4294967294, %s1570_s11   ;;  %s1570_s11 = sphi %s1615_s11, %s17_s11   ;;  %s1566_s10 = sphi %s1613_s10, %s2040_s10   ;;  %s1562_s9 = sphi %s1611_s9, %s2039_s9   ;;  %s1558_s8 = sphi %s1609_s8, %s2038_s8   ;;  %s1554_s7 = sphi %s1607_s7, %s2037_s7   ;;  %s1550_s6 = sphi %s1605_s6, %s2036_s6  }
   0x7   : > { %s26_s14 = sadd.s32 1, %s1566_s10  ;;  %s38_s15 = sadd.s32 1, %s1558_s8 }
   0x8   : > { %p27_p0 = scmp.ge.s32.totalorder %s26_s14, 2  ;;  %p45_p1 = scmp.ne.s32.totalorder %s1558_s8, %s1554_s7 }
   0x9   : > { %p46_p2 = scmp.eq.s32.totalorder %s1570_s11, 0  ;;  %p51_p3 = scmp.ne.s32.totalorder %s1554_s7, %s1550_s6 }
   0xa   : > { %s2042_s14 = smov (%p27_p0, %s26_s14), 0  ;;  %p52_p5 = scmp.eq.s32.totalorder %s1359_s12, 0 }
   0xb   : > { %p1646_p4 = por %p46_p2, %p45_p1  ;;  %s34_s17 = ssub.s32 %s1566_s10, %s2042_s14 }
   0xc   : > { %p77_p6 = scmp.eq.s32.totalorder %s1359_s12, 1  ;;  %p36_p7 = scmp.eq.s32.totalorder %s34_s17, 0 }
   0xd   : > { %p1652_p8 = por %p52_p5, %p51_p3  ;;  %p83_p10 = scmp.eq.s32.totalorder %s1360_s13, 1 }
   0xe   : > { %p1656_p9 = por %p77_p6, %p45_p1  ;;  %p1387_p13 = scmp.lt.s32.totalorder %s1570_s11, 2 }
   0xf   : > { %s1661_s20 = scalar_select %p36_p7, %s1558_s8, %s38_s15  }
  0x10   : > { %s2030_s19 = scalar_select %p1656_p9, 1, 0 }
  0x11   : > { %p1663_p11 = por %p83_p10, %p51_p3  ;;  %s103_s22 = sand.u32 1, %s1558_s8  }
  0x12   : > { %s1363_s23 = sshll.u32 %s103_s22, 5  ;;  %s1364_s24 = sshll.u32 %s1566_s10, 7 }
  0x13   : > { %s2031_s21 = scalar_select %p1663_p11, 1, 0 }
  0x14   : > { %s1674_s27 = scalar_lea.hbm %s2025_s0, %s1364_s24  ;;  %s107_s28 = scalar_lea.vmem [#allocation2], %s1363_s23 }
  0x15   : > { %s115_s29 = sshll.u32 %s107_s28, 4  ;;  %p1680_p0 = pnand %p1387_p13, %p1646_p4  ;;  %s1676_s29 = int_to_ptr.vmem [resolvable:$true] %s115_s29 }
  0x16   : > { %s1684_s2 = scalar_lea.sflag [#allocation3], %s103_s22  ;;  %s1458_s3 = scalar_lea.hbm %s1674_s27, 512 }
  0x17   : > { %p1459_p1 = scmp.ne.s32.totalorder %s1674_s27, %s1458_s3  ;;  %p1460_p2 = pneg %p1680_p0 }
  0x18   : > { %s1463_s12 = scalar_lea.hbm %s2025_s0, 1024  ;;  %p1464_p4 = scmp.lt.u32.totalorder %s1674_s27, %s2025_s0 }
  0x19   : > { %p1461_p3 = pnand %p1460_p2, %p1459_p1  ;;  %p1465_p6 = scmp.lt.u32.totalorder %s1463_s12, %s1458_s3 }
  0x1a   : > { %p1467_p10 = scmp.lt.u32.totalorder %s1458_s3, %s1674_s27 }
  0x1b   : > { %p1462_p5 = pneg %p1461_p3  ;;  %p1466_p7 = por %p1465_p6, %p1464_p4 }
  0x1d   : > { %p1468_p13 = por %p1467_p10, %p1466_p7 }
  0x1f   : > { %p1469_p12 = pnand %p1468_p13, %p1462_p5 }
  0x21   : > { %1472 = shalt.err (!%p1469_p12)
}
  0x22   : > { %s1473_s16 = scalar_lea.vmem %s1676_s29, 512  ;;  %s1572_s17 = smov [#allocation2]  }
  0x23   : > { %p1474_p1 = scmp.ne.s32.totalorder %s1676_s29, %s1473_s16  ;;  %s1478_s22 = sshll.u32 %s1572_s17, 4  ;;  %s1479_s22 = int_to_ptr.vmem [resolvable:$false] %s1478_s22 }
  0x24   : > { %s1480_s23 = scalar_lea.vmem %s1479_s22, 1024  ;;  %p1481_p9 = scmp.lt.s32.totalorder %s1676_s29, %s1479_s22 }
  0x25   : > { %p1476_p3 = pnand %p1474_p1, %p1460_p2  ;;  %p1482_p4 = scmp.lt.s32.totalorder %s1480_s23, %s1473_s16 }
  0x27   : > { %p1477_p11 = pneg %p1476_p3  ;;  %p1483_p6 = por %p1482_p4, %p1481_p9 }
  0x29   : > { %p1484_p7 = pnand %p1483_p6, %p1477_p11 }
  0x2b   : > { %1487 = shalt.err (!%p1484_p7)
}
  0x2c   : > { %s1573_s24 = smov 256   ;;  %s1574_s25 = smov 128  }
  0x2d   : > { %s1575_s26 = smov 8   ;;  %p1365_p12 = scmp.ge.s32.totalorder %s1570_s11, 1 }
  0x2e   : > { %1382 = dma.hbm_to_vmem [thread:$0]  (!%p1680_p0), %s1674_s27, 512, %s1676_s29, %s1684_s2, %s1573_s24, %s1574_s25, %s1575_s26  }
  0x2f   : > { %p123_p2 = scmp.lt.s32.totalorder %s1570_s11, 3 }
  0x31   : > { %p124_p5 = pnand %p1365_p12, %p123_p2 }
  0x32   : > { %s1715_s28 = sand.u32 (!%p124_p5), 1, %s1554_s7  }
  0x33   : > { %127 = sbr.rel (%p124_p5) target bundleno = 511 (0x1ff), region = 24  ;;  %s1366_s3 = sshll.u32 (!%p124_p5), %s1715_s28, 5 }
  0x34   : > { %s130_s4 = scalar_lea.sflag (!%p124_p5), [#allocation3], %s1715_s28  ;;  %s1719_s5 = scalar_lea.vmem (!%p124_p5), [#allocation2], %s1366_s3 }
  0x3a   : > { %1541 = dma.done.wait (%p1652_p8), %s130_s4, 512  }
  0x3b   : > { %1543 = vsyncadd (%p1652_p8), %s130_s4, 4294966784  ;;  %v155_v0 = vlaneseq  ;;  %v1369_v6 = vld [vmem:[%s1719_s5 + $0x10] sm:$0xff]  ;;  %v1370_v19 = vld [vmem:[%s1719_s5 + $0x18] sm:$0xff]  ;;  %v1576_v54 = vmov 1983009808   ;;  %vm331_vm0 = vcmask 7168  }
  0x3c   : > { %v152_v28 = vld [vmem:[%s1719_s5] sm:$0xff]  ;;  %v1368_v37 = vld [vmem:[%s1719_s5 + $0x8] sm:$0xff]  ;;  %v351_v55 = vunpack.c.l.s4 %v1576_v54  ;;  %v1577_v59 = vmov 1934713408   ;;  %s1578_s18 = smov 4   ;;  %s1579_s27 = smov 2  }
  0x3d   : > { %v1725_v1 = vshrl.u32 %v155_v0, 7  ;;  %v415_v60 = vunpack.c.l.s4 %v1577_v59  ;;  %s1580_s29 = smov 8   ;;  %s1581_s30 = smov 6   ;;  %vm680_vm1 = vcmask 15360   ;;  %vm682_vm2 = vcmask 31744  }
  0x3e   : > { %v352_v58 = vunpack.c.0.s8 %v351_v55  ;;  %s1582_s2 = smov 12   ;;  %s1583_s12 = smov 10   ;;  %vm684_vm3 = vcmask 48128   ;;  %vm686_vm4 = vcmask 64512   ;;  %vm688_vm5 = vcmask 80896  }
  0x3f   : > { %v1728_v2 = vsub.s32 2, %v1725_v1  ;;  %v1731_v3 = vsub.s32 0, %v1725_v1  ;;  %v1734_v4 = vsub.s32 3, %v1725_v1  ;;  %v1737_v5 = vsub.s32 1, %v1725_v1  ;;  %s1584_s13 = smov 14   ;;  %s1585_s15 = smov 16  }
  0x40   : > { %v1745_v11 = vsub.s32 5, %v1725_v1  ;;  %v1748_v12 = vsub.s32 4, %v1725_v1  ;;  %v1753_v15 = vsub.s32 7, %v1725_v1  ;;  %v1756_v16 = vsub.s32 6, %v1725_v1  ;;  %s1586_s16 = smov 18   ;;  %s1587_s17 = smov 20  }
  0x41   : > { %v741_v7 = vrot.slane %v1369_v6, %v1728_v2  ;;  %v719_v8 = vrot.slane %v1369_v6, %v1731_v3  ;;  %v752_v9 = vrot.slane %v1369_v6, %v1734_v4  ;;  %v730_v10 = vrot.slane %v1369_v6, %v1737_v5  ;;  %s1588_s22 = smov 22   ;;  %s1589_s23 = smov 24  }
  0x42   : > { %v774_v13 = vrot.slane %v1369_v6, %v1745_v11  ;;  %v763_v14 = vrot.slane %v1369_v6, %v1748_v12  ;;  %v796_v17 = vrot.slane %v1369_v6, %v1753_v15  ;;  %v785_v18 = vrot.slane %v1369_v6, %v1756_v16  ;;  %s1590_s24 = smov 26   ;;  %s1591_s25 = smov 28  }
  0x43   : > { %743 = vbcast.lane.b32.xlu1 %v741_v7, 256  ;;  %721 = vbcast.lane.b32.xlu0 %v719_v8, 256  ;;  %v818_v20 = vrot.slane %v1370_v19, %v1737_v5  ;;  %v807_v21 = vrot.slane %v1370_v19, %v1731_v3  ;;  %v840_v22 = vrot.slane %v1370_v19, %v1734_v4  ;;  %s1592_s26 = smov 30   ;;  %vm690_vm6 = vcmask 97280   ;;  %s1593_s3 = smov 32  }
  0x44   : > { %v829_v23 = vrot.slane %v1370_v19, %v1728_v2  ;;  %v862_v24 = vrot.slane %v1370_v19, %v1745_v11  ;;  %v851_v25 = vrot.slane %v1370_v19, %v1748_v12  ;;  %v884_v26 = vrot.slane %v1370_v19, %v1753_v15  ;;  %s1367_s4 = sshll.u32 %s1715_s28, 3  ;;  %p2033_p9 = scmp.ne.s32.totalorder %s2030_s19, 0 }
  0x45   : > { %v873_v27 = vrot.slane %v1370_v19, %v1756_v16  ;;  %v169_v29 = vrot.slane %v152_v28, %v1737_v5  ;;  %v158_v30 = vrot.slane %v152_v28, %v1731_v3  ;;  %v191_v31 = vrot.slane %v152_v28, %v1734_v4  ;;  %s151_s5 = scalar_lea.vmem [#allocation5], %s1367_s4 }
  0x46   : > { %v180_v32 = vrot.slane %v152_v28, %v1728_v2  ;;  %v213_v33 = vrot.slane %v152_v28, %v1745_v11  ;;  %v202_v34 = vrot.slane %v152_v28, %v1748_v12  ;;  %v235_v35 = vrot.slane %v152_v28, %v1753_v15 }
  0x47   : > { %754 = vbcast.lane.b32.xlu1 %v752_v9, 256  ;;  %732 = vbcast.lane.b32.xlu0 %v730_v10, 256  ;;  %v224_v36 = vrot.slane %v152_v28, %v1756_v16  ;;  %v257_v38 = vrot.slane %v1368_v37, %v1737_v5  ;;  %v246_v39 = vrot.slane %v1368_v37, %v1731_v3  ;;  %vm692_vm7 = vcmask 113664  }
  0x48   : > { %v279_v40 = vrot.slane %v1368_v37, %v1734_v4  ;;  %v268_v41 = vrot.slane %v1368_v37, %v1728_v2  ;;  %v301_v42 = vrot.slane %v1368_v37, %v1745_v11  ;;  %v290_v43 = vrot.slane %v1368_v37, %v1748_v12 }
  0x49   : > { %v323_v44 = vrot.slane %v1368_v37, %v1753_v15  ;;  %v312_v45 = vrot.slane %v1368_v37, %v1756_v16  ;;  %v1792_v4 = vsub.s32 %v352_v58, %v1725_v1  ;;  %vm694_vm8 = vcmask 130048  }
  0x4a   : > { %vm696_vm9 = vcmask 146432   ;;  %vm698_vm10 = vcmask 162816   ;;  %vm700_vm11 = vcmask 179200   ;;  %vm702_vm12 = vcmask 195584  }
  0x4b   : > { %776 = vbcast.lane.b32.xlu1 %v774_v13, 256  ;;  %765 = vbcast.lane.b32.xlu0 %v763_v14, 256  ;;  %vm704_vm13 = vcmask 211968   ;;  %vm706_vm14 = vcmask 228352   ;;  %vm708_vm15 = vcmask 244736  }
  0x4f   : > { %798 = vbcast.lane.b32.xlu1 %v796_v17, 256  ;;  %787 = vbcast.lane.b32.xlu0 %v785_v18, 256 }
  0x53   : > { %820 = vbcast.lane.b32.xlu1 %v818_v20, 256  ;;  %809 = vbcast.lane.b32.xlu0 %v807_v21, 256 }
  0x57   : > { %842 = vbcast.lane.b32.xlu1 %v840_v22, 256  ;;  %831 = vbcast.lane.b32.xlu0 %v829_v23, 256 }
  0x5b   : > { %864 = vbcast.lane.b32.xlu1 %v862_v24, 256  ;;  %853 = vbcast.lane.b32.xlu0 %v851_v25, 256 }
  0x5f   : > { %886 = vbcast.lane.b32.xlu1 %v884_v26, 256  ;;  %875 = vbcast.lane.b32.xlu0 %v873_v27, 256 }
  0x63   : > { %736 = vbcast.lane.b32.xlu1 %v730_v10, 264  ;;  %725 = vbcast.lane.b32.xlu0 %v719_v8, 264 }
  0x67   : > { %758 = vbcast.lane.b32.xlu1 %v752_v9, 264  ;;  %747 = vbcast.lane.b32.xlu0 %v741_v7, 264  ;;  %v416_v7 = vunpack.c.0.s8 %v415_v60 }
  0x6b   : > { %780 = vbcast.lane.b32.xlu1 %v774_v13, 264  ;;  %769 = vbcast.lane.b32.xlu0 %v763_v14, 264  ;;  %v1797_v14 = vsub.s32 %v416_v7, %v1725_v1 }
  0x6f   : > { %802 = vbcast.lane.b32.xlu1 %v796_v17, 264  ;;  %791 = vbcast.lane.b32.xlu0 %v785_v18, 264 }
  0x73   : > { %824 = vbcast.lane.b32.xlu1 %v818_v20, 264  ;;  %813 = vbcast.lane.b32.xlu0 %v807_v21, 264 }
  0x77   : > { %846 = vbcast.lane.b32.xlu1 %v840_v22, 264  ;;  %835 = vbcast.lane.b32.xlu0 %v829_v23, 264 }
  0x7b   : > { %868 = vbcast.lane.b32.xlu1 %v862_v24, 264  ;;  %857 = vbcast.lane.b32.xlu0 %v851_v25, 264 }
  0x7f   : > { %890 = vbcast.lane.b32.xlu1 %v884_v26, 264  ;;  %879 = vbcast.lane.b32.xlu0 %v873_v27, 264 }
  0x83   : > { %171 = vbcast.lane.b32.xlu1 %v169_v29, 256  ;;  %160 = vbcast.lane.b32.xlu0 %v158_v30, 256 }
  0x87   : > { %193 = vbcast.lane.b32.xlu1 %v191_v31, 256  ;;  %182 = vbcast.lane.b32.xlu0 %v180_v32, 256 }
  0x8b   : > { %215 = vbcast.lane.b32.xlu1 %v213_v33, 256  ;;  %204 = vbcast.lane.b32.xlu0 %v202_v34, 256 }
  0x8f   : > { %237 = vbcast.lane.b32.xlu1 %v235_v35, 256  ;;  %226 = vbcast.lane.b32.xlu0 %v224_v36, 256 }
  0x93   : > { %259 = vbcast.lane.b32.xlu1 %v257_v38, 256  ;;  %248 = vbcast.lane.b32.xlu0 %v246_v39, 256 }
  0x97   : > { %281 = vbcast.lane.b32.xlu1 %v279_v40, 256  ;;  %270 = vbcast.lane.b32.xlu0 %v268_v41, 256 }
  0x9b   : > { %303 = vbcast.lane.b32.xlu1 %v301_v42, 256  ;;  %292 = vbcast.lane.b32.xlu0 %v290_v43, 256 }
  0x9f   : > { %325 = vbcast.lane.b32.xlu1 %v323_v44, 256  ;;  %314 = vbcast.lane.b32.xlu0 %v312_v45, 256 }
  0xa3   : > { %175 = vbcast.lane.b32.xlu1 %v169_v29, 264  ;;  %164 = vbcast.lane.b32.xlu0 %v158_v30, 264 }
  0xa7   : > { %197 = vbcast.lane.b32.xlu1 %v191_v31, 264  ;;  %186 = vbcast.lane.b32.xlu0 %v180_v32, 264 }
  0xab   : > { %219 = vbcast.lane.b32.xlu1 %v213_v33, 264  ;;  %208 = vbcast.lane.b32.xlu0 %v202_v34, 264 }
  0xaf   : > { %241 = vbcast.lane.b32.xlu1 %v235_v35, 264  ;;  %230 = vbcast.lane.b32.xlu0 %v224_v36, 264 }
  0xb3   : > { %263 = vbcast.lane.b32.xlu1 %v257_v38, 264  ;;  %252 = vbcast.lane.b32.xlu0 %v246_v39, 264 }
  0xb5   : > { %v744_v46 = vpop.permute.xlu1 %743  ;;  %v722_v47 = vpop.permute.xlu0 %721 }
  0xb7   : > { %285 = vbcast.lane.b32.xlu1 %v279_v40, 264  ;;  %274 = vbcast.lane.b32.xlu0 %v268_v41, 264 }
  0xb9   : > { %v755_v48 = vpop.permute.xlu1 %754  ;;  %v733_v49 = vpop.permute.xlu0 %732 }
  0xbb   : > { %307 = vbcast.lane.b32.xlu1 %v301_v42, 264  ;;  %296 = vbcast.lane.b32.xlu0 %v290_v43, 264 }
  0xbd   : > { %v777_v50 = vpop.permute.xlu1 %776  ;;  %v766_v51 = vpop.permute.xlu0 %765 }
  0xbf   : > { %329 = vbcast.lane.b32.xlu1 %v323_v44, 264  ;;  %318 = vbcast.lane.b32.xlu0 %v312_v45, 264 }
  0xc1   : > { %v799_v52 = vpop.permute.xlu1 %798  ;;  %v788_v53 = vpop.permute.xlu0 %787 }
  0xc5   : > { %v821_v56 = vpop.permute.xlu1 %820  ;;  %v810_v57 = vpop.permute.xlu0 %809 }
  0xc6   : > { %v894_v2 = vsel %vm331_vm0, %v733_v49, %v821_v56  ;;  %v892_v3 = vsel %vm331_vm0, %v722_v47, %v810_v57 }
  0xc9   : > { %v843_v61 = vpop.permute.xlu1 %842  ;;  %v832_v62 = vpop.permute.xlu0 %831 }
  0xca   : > { %v898_v63 = vsel %vm331_vm0, %v755_v48, %v843_v61  ;;  %v896_v0 = vsel %vm331_vm0, %v744_v46, %v832_v62 }
  0xcb   : > { %v924_v5 = vcombine.low %v894_v2, %v898_v63  ;;  %v908_v6 = vcombine.low %v892_v3, %v896_v0  ;;  %v925_v10 = vcombine.high %v894_v2, %v898_v63  ;;  %v909_v12 = vcombine.high %v892_v3, %v896_v0 }
  0xcd   : > { %v865_v8 = vpop.permute.xlu1 %864  ;;  %v854_v9 = vpop.permute.xlu0 %853  ;;  %v932_v11 = vrot.slane %v924_v5, %v1792_v4  ;;  %v916_v13 = vrot.slane %v908_v6, %v1792_v4  ;;  %v939_v25 = vrot.slane %v925_v10, %v1792_v4  ;;  %v923_v26 = vrot.slane %v909_v12, %v1792_v4 }
  0xce   : > { %v902_v17 = vsel %vm331_vm0, %v777_v50, %v865_v8  ;;  %v900_v18 = vsel %vm331_vm0, %v766_v51, %v854_v9 }
  0xcf   : > { %v972_v1 = vcombine.low %v916_v13, %v932_v11  ;;  %v973_v27 = vcombine.high %v916_v13, %v932_v11  ;;  %v988_v37 = vcombine.low %v923_v26, %v939_v25  ;;  %v989_v49 = vcombine.high %v923_v26, %v939_v25 }
  0xd1   : > { %v887_v15 = vpop.permute.xlu1 %886  ;;  %v876_v16 = vpop.permute.xlu0 %875  ;;  %v987_v40 = vrot.slane %v973_v27, %v1797_v14  ;;  %v1812_v42 = vrot.slane %v972_v1, %v1797_v14  ;;  %v1003_v58 = vrot.slane %v989_v49, %v1797_v14 }
  0xd2   : > { %v906_v19 = vsel %vm331_vm0, %v799_v52, %v887_v15  ;;  %v904_v20 = vsel %vm331_vm0, %v788_v53, %v876_v16  ;;  %v996_v52 = vrot.slane %v988_v37, %v1797_v14 }
  0xd3   : > { %v956_v21 = vcombine.low %v902_v17, %v906_v19  ;;  %v957_v22 = vcombine.high %v902_v17, %v906_v19  ;;  %v940_v23 = vcombine.low %v900_v18, %v904_v20  ;;  %v941_v24 = vcombine.high %v900_v18, %v904_v20 }
  0xd5   : > { %v964_v28 = vrot.slane %v956_v21, %v1792_v4  ;;  %v971_v29 = vrot.slane %v957_v22, %v1792_v4  ;;  %v948_v30 = vrot.slane %v940_v23, %v1792_v4  ;;  %v955_v31 = vrot.slane %v941_v24, %v1792_v4  ;;  %v737_v32 = vpop.permute.xlu1 %736  ;;  %v726_v33 = vpop.permute.xlu0 %725 }
  0xd7   : > { %v1004_v34 = vcombine.low %v948_v30, %v964_v28  ;;  %v1005_v35 = vcombine.high %v948_v30, %v964_v28  ;;  %v1020_v36 = vcombine.low %v955_v31, %v971_v29  ;;  %v1021_v44 = vcombine.high %v955_v31, %v971_v29 }
  0xd9   : > { %v759_v38 = vpop.permute.xlu1 %758  ;;  %v748_v39 = vpop.permute.xlu0 %747  ;;  %v1019_v41 = vrot.slane %v1005_v35, %v1797_v14  ;;  %v1815_v43 = vrot.slane %v1004_v34, %v1797_v14  ;;  %v1028_v47 = vrot.slane %v1020_v36, %v1797_v14  ;;  %v1035_v55 = vrot.slane %v1021_v44, %v1797_v14 }
  0xdb   : > { %v1038_v45 = vcombine.low %v987_v40, %v1019_v41  ;;  %v1037_v46 = vcombine.high %v1812_v42, %v1815_v43  ;;  %v1036_v48 = vcombine.low %v1812_v42, %v1815_v43  ;;  %v1040_v53 = vcombine.low %v996_v52, %v1028_v47 }
  0xdc   : > { %v1039_v54 = vcombine.high %v987_v40, %v1019_v41  ;;  %v1042_v59 = vcombine.low %v1003_v58, %v1035_v55  ;;  %v1041_v60 = vcombine.high %v996_v52, %v1028_v47  ;;  %v1043_v63 = vcombine.high %v1003_v58, %v1035_v55 }
  0xdd   : > { %v781_v50 = vpop.permute.xlu1 %780  ;;  %v770_v51 = vpop.permute.xlu0 %769  ;;  %1185 = vrot.lane.b32.xlu1 %v1038_v45, %s1578_s18  ;;  %1181 = vrot.lane.b32.xlu0 %v1037_v46, %s1579_s27 }
  0xe1   : > { %v803_v56 = vpop.permute.xlu1 %802  ;;  %v792_v57 = vpop.permute.xlu0 %791  ;;  %1193 = vrot.lane.b32.xlu1 %v1040_v53, %s1580_s29  ;;  %1189 = vrot.lane.b32.xlu0 %v1039_v54, %s1581_s30 }
  0xe5   : > { %v825_v61 = vpop.permute.xlu1 %824  ;;  %v814_v62 = vpop.permute.xlu0 %813  ;;  %1201 = vrot.lane.b32.xlu1 %v1042_v59, %s1582_s2  ;;  %1197 = vrot.lane.b32.xlu0 %v1041_v60, %s1583_s12 }
  0xe6   : > { %v895_v6 = vsel %vm331_vm0, %v737_v32, %v825_v61  ;;  %v893_v7 = vsel %vm331_vm0, %v726_v33, %v814_v62 }
  0xe9   : > { %v847_v0 = vpop.permute.xlu1 %846  ;;  %v836_v2 = vpop.permute.xlu0 %835  ;;  %1205 = vrot.lane.b32.xlu0 %v1043_v63, %s1584_s13 }
  0xea   : > { %v899_v3 = vsel %vm331_vm0, %v759_v38, %v847_v0  ;;  %v897_v5 = vsel %vm331_vm0, %v748_v39, %v836_v2 }
  0xeb   : > { %v1060_v8 = vcombine.low %v895_v6, %v899_v3  ;;  %v1044_v9 = vcombine.low %v893_v7, %v897_v5  ;;  %v1061_v25 = vcombine.high %v895_v6, %v899_v3  ;;  %v1045_v26 = vcombine.high %v893_v7, %v897_v5 }
  0xed   : > { %v869_v10 = vpop.permute.xlu1 %868  ;;  %v858_v11 = vpop.permute.xlu0 %857  ;;  %v1068_v12 = vrot.slane %v1060_v8, %v1792_v4  ;;  %v1052_v13 = vrot.slane %v1044_v9, %v1792_v4  ;;  %v1075_v35 = vrot.slane %v1061_v25, %v1792_v4  ;;  %v1059_v36 = vrot.slane %v1045_v26, %v1792_v4 }
  0xee   : > { %v903_v17 = vsel %vm331_vm0, %v781_v50, %v869_v10  ;;  %v901_v18 = vsel %vm331_vm0, %v770_v51, %v858_v11 }
  0xef   : > { %v1108_v1 = vcombine.low %v1052_v13, %v1068_v12  ;;  %v1109_v37 = vcombine.high %v1052_v13, %v1068_v12  ;;  %v1124_v49 = vcombine.low %v1059_v36, %v1075_v35 }
  0xf1   : > { %v891_v15 = vpop.permute.xlu1 %890  ;;  %v880_v16 = vpop.permute.xlu0 %879  ;;  %v1116_v40 = vrot.slane %v1108_v1, %v1797_v14  ;;  %v1123_v52 = vrot.slane %v1109_v37, %v1797_v14  ;;  %v1132_v60 = vrot.slane %v1124_v49, %v1797_v14 }
  0xf2   : > { %v907_v19 = vsel %vm331_vm0, %v803_v56, %v891_v15  ;;  %v905_v20 = vsel %vm331_vm0, %v792_v57, %v880_v16  ;;  %v1125_v57 = vcombine.high %v1059_v36, %v1075_v35 }
  0xf3   : > { %v1092_v21 = vcombine.low %v903_v17, %v907_v19  ;;  %v1093_v22 = vcombine.high %v903_v17, %v907_v19  ;;  %v1076_v23 = vcombine.low %v901_v18, %v905_v20  ;;  %v1077_v24 = vcombine.high %v901_v18, %v905_v20 }
  0xf4   : > { %v1139_v3 = vrot.slane %v1125_v57, %v1797_v14 }
  0xf5   : > { %v1100_v27 = vrot.slane %v1092_v21, %v1792_v4  ;;  %v1084_v28 = vrot.slane %v1076_v23, %v1792_v4  ;;  %v172_v29 = vpop.permute.xlu1 %171  ;;  %v161_v30 = vpop.permute.xlu0 %160  ;;  %v1107_v31 = vrot.slane %v1093_v22, %v1792_v4  ;;  %v1091_v32 = vrot.slane %v1077_v24, %v1792_v4 }
  0xf7   : > { %v1140_v33 = vcombine.low %v1084_v28, %v1100_v27  ;;  %v1141_v34 = vcombine.high %v1084_v28, %v1100_v27  ;;  %v1156_v44 = vcombine.low %v1091_v32, %v1107_v31  ;;  %v1157_v53 = vcombine.high %v1091_v32, %v1107_v31 }
  0xf9   : > { %v194_v38 = vpop.permute.xlu1 %193  ;;  %v183_v39 = vpop.permute.xlu0 %182  ;;  %v1148_v41 = vrot.slane %v1140_v33, %v1797_v14  ;;  %v1155_v47 = vrot.slane %v1141_v34, %v1797_v14  ;;  %v1164_v56 = vrot.slane %v1156_v44, %v1797_v14  ;;  %v1171_v63 = vrot.slane %v1157_v53, %v1797_v14 }
  0xfb   : > { %v1172_v45 = vcombine.low %v1116_v40, %v1148_v41  ;;  %v1173_v46 = vcombine.high %v1116_v40, %v1148_v41  ;;  %v1174_v54 = vcombine.low %v1123_v52, %v1155_v47  ;;  %v1175_v55 = vcombine.high %v1123_v52, %v1155_v47 }
  0xfc   : > { %v1176_v61 = vcombine.low %v1132_v60, %v1164_v56  ;;  %v1177_v62 = vcombine.high %v1132_v60, %v1164_v56  ;;  %v1178_v5 = vcombine.low %v1139_v3, %v1171_v63  ;;  %v1179_v6 = vcombine.high %v1139_v3, %v1171_v63 }
  0xfd   : > { %1209 = vrot.lane.b32.xlu1 %v1172_v45, %s1585_s15  ;;  %v216_v50 = vpop.permute.xlu1 %215  ;;  %1213 = vrot.lane.b32.xlu0 %v1173_v46, %s1586_s16  ;;  %v205_v51 = vpop.permute.xlu0 %204 }
 0x101   : > { %1217 = vrot.lane.b32.xlu1 %v1174_v54, %s1587_s17  ;;  %v238_v58 = vpop.permute.xlu1 %237  ;;  %1221 = vrot.lane.b32.xlu0 %v1175_v55, %s1588_s22  ;;  %v227_v59 = vpop.permute.xlu0 %226 }
 0x105   : > { %1225 = vrot.lane.b32.xlu1 %v1176_v61, %s1589_s23  ;;  %v260_v0 = vpop.permute.xlu1 %259  ;;  %1229 = vrot.lane.b32.xlu0 %v1177_v62, %s1590_s24  ;;  %v249_v2 = vpop.permute.xlu0 %248 }
 0x106   : > { %v334_v7 = vsel %vm331_vm0, %v172_v29, %v260_v0  ;;  %v332_v8 = vsel %vm331_vm0, %v161_v30, %v249_v2 }
 0x109   : > { %1233 = vrot.lane.b32.xlu1 %v1178_v5, %s1591_s25  ;;  %v282_v9 = vpop.permute.xlu1 %281  ;;  %1237 = vrot.lane.b32.xlu0 %v1179_v6, %s1592_s26  ;;  %v271_v10 = vpop.permute.xlu0 %270 }
 0x10a   : > { %v338_v11 = vsel %vm331_vm0, %v194_v38, %v282_v9  ;;  %v336_v12 = vsel %vm331_vm0, %v183_v39, %v271_v10 }
 0x10b   : > { %v364_v13 = vcombine.low %v334_v7, %v338_v11  ;;  %v348_v15 = vcombine.low %v332_v8, %v336_v12  ;;  %v365_v16 = vcombine.high %v334_v7, %v338_v11  ;;  %v349_v17 = vcombine.high %v332_v8, %v336_v12 }
 0x10d   : > { %v304_v18 = vpop.permute.xlu1 %303  ;;  %v293_v19 = vpop.permute.xlu0 %292  ;;  %v372_v20 = vrot.slane %v364_v13, %v1792_v4  ;;  %v356_v21 = vrot.slane %v348_v15, %v1792_v4  ;;  %v379_v22 = vrot.slane %v365_v16, %v1792_v4  ;;  %v363_v23 = vrot.slane %v349_v17, %v1792_v4 }
 0x10e   : > { %v342_v24 = vsel %vm331_vm0, %v216_v50, %v304_v18  ;;  %v340_v25 = vsel %vm331_vm0, %v205_v51, %v293_v19 }
 0x10f   : > { %v412_v27 = vcombine.low %v356_v21, %v372_v20  ;;  %v413_v28 = vcombine.high %v356_v21, %v372_v20  ;;  %v428_v35 = vcombine.low %v363_v23, %v379_v22  ;;  %v429_v50 = vcombine.high %v363_v23, %v379_v22 }
 0x111   : > { %v326_v26 = vpop.permute.xlu1 %325  ;;  %v315_v1 = vpop.permute.xlu0 %314  ;;  %v1881_v44 = vrot.slane %v412_v27, %v1797_v14  ;;  %v427_v49 = vrot.slane %v413_v28, %v1797_v14  ;;  %v436_v51 = vrot.slane %v428_v35, %v1797_v14  ;;  %v443_v60 = vrot.slane %v429_v50, %v1797_v14 }
 0x112   : > { %v346_v29 = vsel %vm331_vm0, %v238_v58, %v326_v26  ;;  %v344_v30 = vsel %vm331_vm0, %v227_v59, %v315_v1 }
 0x113   : > { %v396_v31 = vcombine.low %v342_v24, %v346_v29  ;;  %v397_v32 = vcombine.high %v342_v24, %v346_v29  ;;  %v380_v33 = vcombine.low %v340_v25, %v344_v30  ;;  %v381_v34 = vcombine.high %v340_v25, %v344_v30 }
 0x115   : > { %v404_v36 = vrot.slane %v396_v31, %v1792_v4  ;;  %v411_v37 = vrot.slane %v397_v32, %v1792_v4  ;;  %v388_v38 = vrot.slane %v380_v33, %v1792_v4  ;;  %v395_v39 = vrot.slane %v381_v34, %v1792_v4  ;;  %v176_v40 = vpop.permute.xlu1 %175  ;;  %v165_v41 = vpop.permute.xlu0 %164 }
 0x117   : > { %v444_v45 = vcombine.low %v388_v38, %v404_v36  ;;  %v445_v46 = vcombine.high %v388_v38, %v404_v36  ;;  %v460_v47 = vcombine.low %v395_v39, %v411_v37  ;;  %v461_v52 = vcombine.high %v395_v39, %v411_v37 }
 0x119   : > { %v198_v53 = vpop.permute.xlu1 %197  ;;  %v187_v54 = vpop.permute.xlu0 %186  ;;  %v1886_v55 = vrot.slane %v444_v45, %v1797_v14  ;;  %v459_v56 = vrot.slane %v445_v46, %v1797_v14  ;;  %v468_v57 = vrot.slane %v460_v47, %v1797_v14  ;;  %v475_v3 = vrot.slane %v461_v52, %v1797_v14 }
 0x11b   : > { %v477_v58 = vcombine.high %v1881_v44, %v1886_v55  ;;  %v478_v59 = vcombine.low %v427_v49, %v459_v56  ;;  %v476_v61 = vcombine.low %v1881_v44, %v1886_v55  ;;  %v479_v0 = vcombine.high %v427_v49, %v459_v56 }
 0x11c   : > { %v480_v2 = vcombine.low %v436_v51, %v468_v57  ;;  %v481_v7 = vcombine.high %v436_v51, %v468_v57  ;;  %v482_v8 = vcombine.low %v443_v60, %v475_v3  ;;  %v483_v11 = vcombine.high %v443_v60, %v475_v3 }
 0x11d   : > { %v220_v62 = vpop.permute.xlu1 %219  ;;  %621 = vrot.lane.b32.xlu1 %v477_v58, %s1579_s27  ;;  %v209_v63 = vpop.permute.xlu0 %208  ;;  %625 = vrot.lane.b32.xlu0 %v478_v59, %s1578_s18  ;;  %s1372_s18 = sshll.u32 %s1562_s9, 7  ;;  %s1277_s27 = sshll.u32 %s151_s5, 4  ;;  %s1978_s27 = int_to_ptr.vmem [resolvable:$true] %s1277_s27 }
 0x11e   : > { %s1594_s9 = smov [#allocation5]  }
 0x121   : > { %v242_v5 = vpop.permute.xlu1 %241  ;;  %629 = vrot.lane.b32.xlu1 %v479_v0, %s1581_s30  ;;  %v231_v6 = vpop.permute.xlu0 %230  ;;  %633 = vrot.lane.b32.xlu0 %v480_v2, %s1580_s29 }
 0x125   : > { %v264_v9 = vpop.permute.xlu1 %263  ;;  %637 = vrot.lane.b32.xlu1 %v481_v7, %s1583_s12  ;;  %v253_v10 = vpop.permute.xlu0 %252  ;;  %641 = vrot.lane.b32.xlu0 %v482_v8, %s1582_s2  ;;  %s1976_s2 = scalar_lea.hbm %s2026_s1, %s1372_s18  ;;  %s1262_s12 = scalar_lea.sflag [#allocation4], %s1715_s28 }
 0x126   : > { %v335_v12 = vsel %vm331_vm0, %v176_v40, %v264_v9  ;;  %v333_v13 = vsel %vm331_vm0, %v165_v41, %v253_v10 }
 0x129   : > { %v286_v15 = vpop.permute.xlu1 %285  ;;  %645 = vrot.lane.b32.xlu1 %v483_v11, %s1584_s13  ;;  %v275_v16 = vpop.permute.xlu0 %274  ;;  %s1488_s13 = scalar_lea.vmem %s1978_s27, 128 }
 0x12a   : > { %v339_v17 = vsel %vm331_vm0, %v198_v53, %v286_v15  ;;  %v337_v18 = vsel %vm331_vm0, %v187_v54, %v275_v16  ;;  %p1489_p8 = scmp.ne.s32.totalorder %s1978_s27, %s1488_s13 }
 0x12b   : > { %v500_v19 = vcombine.low %v335_v12, %v339_v17  ;;  %v484_v20 = vcombine.low %v333_v13, %v337_v18  ;;  %v501_v25 = vcombine.high %v335_v12, %v339_v17  ;;  %v485_v26 = vcombine.high %v333_v13, %v337_v18 }
 0x12c   : > { %p1490_p11 = pnand %p1489_p8, %p2033_p9 }
 0x12d   : > { %v308_v21 = vpop.permute.xlu1 %307  ;;  %v297_v22 = vpop.permute.xlu0 %296  ;;  %v508_v23 = vrot.slane %v500_v19, %v1792_v4  ;;  %v492_v24 = vrot.slane %v484_v20, %v1792_v4  ;;  %v515_v37 = vrot.slane %v501_v25, %v1792_v4  ;;  %v499_v38 = vrot.slane %v485_v26, %v1792_v4 }
 0x12e   : > { %v343_v1 = vsel %vm331_vm0, %v220_v62, %v308_v21  ;;  %v341_v27 = vsel %vm331_vm0, %v209_v63, %v297_v22  ;;  %p1491_p0 = pneg %p1490_p11 }
 0x12f   : > { %v548_v30 = vcombine.low %v492_v24, %v508_v23  ;;  %v549_v39 = vcombine.high %v492_v24, %v508_v23  ;;  %v564_v51 = vcombine.low %v499_v38, %v515_v37  ;;  %v565_v59 = vcombine.high %v499_v38, %v515_v37 }
 0x131   : > { %v330_v28 = vpop.permute.xlu1 %329  ;;  %v319_v29 = vpop.permute.xlu0 %318  ;;  %v556_v50 = vrot.slane %v548_v30, %v1797_v14  ;;  %v563_v54 = vrot.slane %v549_v39, %v1797_v14  ;;  %v572_v62 = vrot.slane %v564_v51, %v1797_v14  ;;  %v579_v2 = vrot.slane %v565_v59, %v1797_v14 }
 0x132   : > { %v347_v31 = vsel %vm331_vm0, %v242_v5, %v330_v28  ;;  %v345_v32 = vsel %vm331_vm0, %v231_v6, %v319_v29  ;;  %vm710_vm0 = vcmask 261120  }
 0x133   : > { %v532_v33 = vcombine.low %v343_v1, %v347_v31  ;;  %v533_v34 = vcombine.high %v343_v1, %v347_v31  ;;  %v516_v35 = vcombine.low %v341_v27, %v345_v32  ;;  %v517_v36 = vcombine.high %v341_v27, %v345_v32 }
 0x135   : > { %v540_v40 = vrot.slane %v532_v33, %v1792_v4  ;;  %v547_v41 = vrot.slane %v533_v34, %v1792_v4  ;;  %v524_v45 = vrot.slane %v516_v35, %v1792_v4  ;;  %v531_v46 = vrot.slane %v517_v36, %v1792_v4 }
 0x137   : > { %v580_v47 = vcombine.low %v524_v45, %v540_v40  ;;  %v581_v49 = vcombine.high %v524_v45, %v540_v40  ;;  %v596_v52 = vcombine.low %v531_v46, %v547_v41  ;;  %v597_v60 = vcombine.high %v531_v46, %v547_v41 }
 0x139   : > { %v588_v53 = vrot.slane %v580_v47, %v1797_v14  ;;  %v595_v56 = vrot.slane %v581_v49, %v1797_v14  ;;  %v604_v0 = vrot.slane %v596_v52, %v1797_v14  ;;  %v611_v6 = vrot.slane %v597_v60, %v1797_v14 }
 0x13b   : > { %v612_v57 = vcombine.low %v556_v50, %v588_v53  ;;  %v613_v58 = vcombine.high %v556_v50, %v588_v53  ;;  %v614_v4 = vcombine.low %v563_v54, %v595_v56  ;;  %v615_v63 = vcombine.high %v563_v54, %v595_v56 }
 0x13c   : > { %v616_v3 = vcombine.low %v572_v62, %v604_v0  ;;  %v617_v5 = vcombine.high %v572_v62, %v604_v0  ;;  %v618_v7 = vcombine.low %v579_v2, %v611_v6  ;;  %v619_v8 = vcombine.high %v579_v2, %v611_v6 }
 0x13d   : > { %649 = vrot.lane.b32.xlu0 %v612_v57, %s1585_s15  ;;  %653 = vrot.lane.b32.xlu1 %v613_v58, %s1586_s16  ;;  %s1492_s15 = sshll.u32 %s1594_s9, 4  ;;  %s1493_s15 = int_to_ptr.vmem [resolvable:$false] %s1492_s15 }
 0x13e   : > { %s1494_s16 = scalar_lea.vmem %s1493_s15, 256  ;;  %p1495_p10 = scmp.lt.s32.totalorder %s1978_s27, %s1493_s15 }
 0x13f   : > { %p1496_p13 = scmp.lt.s32.totalorder %s1494_s16, %s1488_s13 }
 0x141   : > { %657 = vrot.lane.b32.xlu0 %v614_v4, %s1587_s17  ;;  %661 = vrot.lane.b32.xlu1 %v615_v63, %s1588_s22  ;;  %p1497_p1 = por %p1496_p13, %p1495_p10 }
 0x143   : > { %p1498_p3 = pnand %p1497_p1, %p1491_p0 }
 0x145   : > { %665 = vrot.lane.b32.xlu0 %v616_v3, %s1589_s23  ;;  %669 = vrot.lane.b32.xlu1 %v617_v5, %s1590_s24 }
 0x149   : > { %673 = vrot.lane.b32.xlu0 %v618_v7, %s1591_s25  ;;  %677 = vrot.lane.b32.xlu1 %v619_v8, %s1592_s26 }
 0x14f   : > { %v1182_v9 = vpop.permute.xlu0 %1181  ;;  %v1186_v10 = vpop.permute.xlu1 %1185 }
 0x150   : > { %v1240_v12 = vsel %vm680_vm1, %v1036_v48, %v1182_v9 }
 0x151   : > { %v1241_v15 = vsel %vm682_vm2, %v1240_v12, %v1186_v10 }
 0x153   : > { %v1190_v11 = vpop.permute.xlu0 %1189  ;;  %v1194_v14 = vpop.permute.xlu1 %1193 }
 0x154   : > { %v1242_v16 = vsel %vm684_vm3, %v1241_v15, %v1190_v11 }
 0x155   : > { %v1243_v17 = vsel %vm686_vm4, %v1242_v16, %v1194_v14 }
 0x157   : > { %v1198_v13 = vpop.permute.xlu0 %1197  ;;  %v1202_v18 = vpop.permute.xlu1 %1201 }
 0x158   : > { %v1244_v19 = vsel %vm688_vm5, %v1243_v17, %v1198_v13 }
 0x159   : > { %v1245_v42 = vsel %vm690_vm6, %v1244_v19, %v1202_v18 }
 0x15b   : > { %v1206_v20 = vpop.permute.xlu0 %1205 }
 0x15c   : > { %v1246_v43 = vsel %vm692_vm7, %v1245_v42, %v1206_v20 }
 0x16f   : > { %v1210_v48 = vpop.permute.xlu1 %1209  ;;  %v1214_v21 = vpop.permute.xlu0 %1213 }
 0x170   : > { %v1247_v22 = vsel %vm694_vm8, %v1246_v43, %v1210_v48 }
 0x171   : > { %v1248_v23 = vsel %vm696_vm9, %v1247_v22, %v1214_v21 }
 0x173   : > { %v1218_v24 = vpop.permute.xlu1 %1217  ;;  %v1222_v25 = vpop.permute.xlu0 %1221 }
 0x174   : > { %v1249_v26 = vsel %vm698_vm10, %v1248_v23, %v1218_v24 }
 0x175   : > { %v1250_v1 = vsel %vm700_vm11, %v1249_v26, %v1222_v25 }
 0x177   : > { %v1226_v27 = vpop.permute.xlu1 %1225  ;;  %v1230_v28 = vpop.permute.xlu0 %1229 }
 0x178   : > { %v1251_v29 = vsel %vm702_vm12, %v1250_v1, %v1226_v27 }
 0x179   : > { %v1252_v30 = vsel %vm704_vm13, %v1251_v29, %v1230_v28 }
 0x17b   : > { %v1234_v31 = vpop.permute.xlu1 %1233  ;;  %v1238_v32 = vpop.permute.xlu0 %1237 }
 0x17c   : > { %v1253_v33 = vsel %vm706_vm14, %v1252_v30, %v1234_v31 }
 0x17d   : > { %v1254_v34 = vsel %vm708_vm15, %v1253_v33, %v1238_v32 }
 0x17e   : > { %1256 = vrot.lane.b32.xlu0 %v1254_v34, %s1593_s3 }
 0x18f   : > { %v622_v35 = vpop.permute.xlu1 %621  ;;  %v626_v36 = vpop.permute.xlu0 %625 }
 0x190   : > { %v681_v37 = vsel %vm680_vm1, %v476_v61, %v622_v35  ;;  %vm1259_vm1 = vcmask 523520  }
 0x191   : > { %v683_v38 = vsel %vm682_vm2, %v681_v37, %v626_v36 }
 0x193   : > { %v630_v39 = vpop.permute.xlu1 %629  ;;  %v634_v40 = vpop.permute.xlu0 %633 }
 0x194   : > { %v685_v41 = vsel %vm684_vm3, %v683_v38, %v630_v39 }
 0x195   : > { %v687_v45 = vsel %vm686_vm4, %v685_v41, %v634_v40 }
 0x197   : > { %v638_v46 = vpop.permute.xlu1 %637  ;;  %v642_v47 = vpop.permute.xlu0 %641 }
 0x198   : > { %v689_v49 = vsel %vm688_vm5, %v687_v45, %v638_v46 }
 0x199   : > { %v691_v50 = vsel %vm690_vm6, %v689_v49, %v642_v47 }
 0x19b   : > { %v646_v51 = vpop.permute.xlu1 %645 }
 0x19c   : > { %v693_v44 = vsel %vm692_vm7, %v691_v50, %v646_v51 }
 0x1af   : > { %v650_v55 = vpop.permute.xlu0 %649  ;;  %v654_v61 = vpop.permute.xlu1 %653 }
 0x1b0   : > { %v695_v52 = vsel %vm694_vm8, %v693_v44, %v650_v55 }
 0x1b1   : > { %v697_v53 = vsel %vm696_vm9, %v695_v52, %v654_v61 }
 0x1b3   : > { %v658_v54 = vpop.permute.xlu0 %657  ;;  %v662_v56 = vpop.permute.xlu1 %661 }
 0x1b4   : > { %v699_v57 = vsel %vm698_vm10, %v697_v53, %v658_v54 }
 0x1b5   : > { %v701_v58 = vsel %vm700_vm11, %v699_v57, %v662_v56 }
 0x1b7   : > { %v666_v59 = vpop.permute.xlu0 %665  ;;  %v670_v60 = vpop.permute.xlu1 %669 }
 0x1b8   : > { %v703_v62 = vsel %vm702_vm12, %v701_v58, %v666_v59 }
 0x1b9   : > { %v705_v4 = vsel %vm704_vm13, %v703_v62, %v670_v60 }
 0x1bb   : > { %v674_v63 = vpop.permute.xlu0 %673  ;;  %v678_v0 = vpop.permute.xlu1 %677 }
 0x1bc   : > { %v707_v2 = vsel %vm706_vm14, %v705_v4, %v674_v63 }
 0x1bd   : > { %v709_v3 = vsel %vm708_vm15, %v707_v2, %v678_v0 }
 0x1be   : > { %711 = vst.msk [vmem:[%s151_s5] sm:$0xff] %vm710_vm0, %v709_v3 }
 0x1f0   : > { %v1257_v5 = vpop.permute.xlu0 %1256 }
 0x1f1   : > { %1260 = vst.msk [vmem:[%s151_s5] sm:$0xff] %vm1259_vm1, %v1257_v5 }
 0x1f2   : > { %1501 = shalt.err (!%p1498_p3)
}
 0x1f3   : > { %s1502_s28 = scalar_lea.hbm %s1976_s2, 128  ;;  %s1506_s23 = scalar_lea.hbm %s2026_s1, 256 }
 0x1f4   : > { %p1503_p4 = scmp.ne.s32.totalorder %s1976_s2, %s1502_s28  ;;  %p1507_p12 = scmp.lt.u32.totalorder %s1976_s2, %s2026_s1 }
 0x1f5   : > { %p1508_p2 = scmp.lt.u32.totalorder %s1506_s23, %s1502_s28  ;;  %p1510_p8 = scmp.lt.u32.totalorder %s1502_s28, %s1976_s2 }
 0x1f6   : > { %p1504_p6 = pnand %p1503_p4, %p2033_p9 }
 0x1f7   : > { %p1509_p5 = por %p1508_p2, %p1507_p12 }
 0x1f8   : > { %p1505_p7 = pneg %p1504_p6 }
 0x1f9   : > { %p1511_p11 = por %p1510_p8, %p1509_p5 }
 0x1fb   : > { %p1512_p0 = pnand %p1511_p11, %p1505_p7 }
 0x1fd   : > { %1515 = shalt.err (!%p1512_p0)
}
 0x1fe   : > { %1377 = dma.vmem_to_hbm [thread:$0]  (%p2033_p9), %s1978_s27, 128, %s1976_s2, %s1262_s12  }
 0x1ff PF: > { %s1289_s26 = sand.u32 1, %s1550_s6   ;;  %p2034_p10 = scmp.ne.s32.totalorder %s2031_s21, 0 }
 0x200   : > { %p2035_p13 = scmp.ge.s32.totalorder %s1570_s11, 2  ;;  %s1290_s3 = scalar_lea.sflag [#allocation4], %s1289_s26 }
 0x202   : > { %p1384_p1 = pnand %p2035_p13, %p2034_p10 }
 0x204   : > { %1545 = dma.done.wait (!%p1384_p1), %s1290_s3, 128  }
 0x205   : > { %1547 = vsyncadd (!%p1384_p1), %s1290_s3, 4294967168  ;;  %s17_s11 = sadd.s32 1, %s1570_s11   ;;  %s2036_s6 = smov %s1554_s7 }
 0x206   : > { %p14_p3 = scmp.ge.s32.totalorder %s17_s11, 4   ;;  %s2037_s7 = smov %s1558_s8 }
 0x207   : > { %s2038_s8 = smov %s1661_s20  ;;  %s2039_s9 = smov %s1566_s10 }
 0x208   : > { %s2040_s10 = smov %s2042_s14  ;;  %16 = sbr.rel (!%p14_p3) target bundleno = 6 (0x6), region = 72 }
 0x20f   :  { %1295 = vsyncpa [#allocation3], 1 }
 0x210   :  { %1297 = vsyncpa [#allocation3 + $0x1], 1 }
 0x211   :  { %1298 = vsyncpa [#allocation4], 1 }
 0x212   :  { %1300 = vsyncpa [#allocation4 + $0x1], 1 }

// kernel: tpu_custom_call.1
= control target key start
LH: loop header
LB: loop body
LE: loop exit
PB: predicated region body
PF: predicated region fallthrough
CT: control target
= control target key end

     0   :  { %7 = vsyncpa [#allocation3], 0  ;;  %s3409_s0 = inlined_call_operand.hbm [shape: f32[2,16,32], index: 0, kind: input, shape index: {}]   ;;  %s3410_s1 = inlined_call_operand.hbm [shape: f32[2,4,16,16], index: 1, kind: input, shape index: {}]   ;;  %s3411_s2 = inlined_call_operand.hbm [shape: f32[2,16,64], index: 2, kind: output, shape index: {}]  }
   0x1   :  { %8 = vsyncpa [#allocation6], 0 }
   0x2   :  { %10 = vsyncpa [#allocation6 + $0x1], 0 }
   0x3   :  { %11 = vsyncpa [#allocation4], 0 }
   0x4   :  { %13 = vsyncpa [#allocation4 + $0x1], 0  ;;  %s3055_s9 = smov 0   ;;  %s3057_s10 = smov 0  }
   0x5   :  { %s3059_s11 = smov 0   ;;  %s3061_s12 = smov 0  }
   0x6   :  { %s3063_s13 = smov 0   ;;  %s3065_s14 = smov 0  }
   0x7 LB: > { %s2379_s15 = sadd.s32 4294967295, %s3030_s14   ;;  %s2380_s16 = sadd.s32 4294967294, %s3030_s14   ;;  %s3030_s14 = sphi %s3065_s14, %s19_s14   ;;  %s3026_s13 = sphi %s3063_s13, %s3435_s13   ;;  %s3022_s12 = sphi %s3061_s12, %s3434_s12   ;;  %s3018_s11 = sphi %s3059_s11, %s3433_s11   ;;  %s3014_s10 = sphi %s3057_s10, %s3432_s10   ;;  %s3010_s9 = sphi %s3055_s9, %s3431_s9  }
   0x8   : > { %p74_p0 = scmp.ne.s32.totalorder %s3014_s10, %s3010_s9  ;;  %p3089_p1 = scmp.eq.s32.totalorder %s2379_s15, 0 }
   0x9   : > { %p3093_p2 = scmp.eq.s32.totalorder %s2379_s15, 1  ;;  %p106_p3 = scmp.eq.s32.totalorder %s2380_s16, 1 }
   0xa   : > { %s3416_s17 = scalar_select %p3089_p1, 1, 0 }
   0xb   : > { %s3417_s18 = scalar_select %p3093_p2, 1, 0 }
   0xc   : > { %p3099_p4 = por %p3089_p1, %p74_p0  ;;  %p2381_p5 = scmp.ge.s32.totalorder %s3030_s14, 1 }
   0xd   : > { %p3104_p6 = por %p106_p3, %p74_p0  ;;  %p113_p7 = scmp.lt.s32.totalorder %s3030_s14, 3 }
   0xe   : > { %s3418_s19 = scalar_select %p3099_p4, 1, 0 }
   0xf   : > { %s3419_s20 = scalar_select %p3104_p6, 1, 0 }
  0x10   : > { %p3109_p8 = pnand %p2381_p5, %p113_p7  ;;  %s3032_s22 = smov [#allocation2]  }
  0x11   : > { %s125_s23 = sshll.u32 %s3032_s22, 4  ;;  %s31_s25 = sadd.s32 1, %s3026_s13  ;;  %s126_s23 = int_to_ptr.vmem [resolvable:$true] %s125_s23 }
  0x12   : > { %s3420_s21 = scalar_select %p3109_p8, 1, 0 }
  0x13   : > { %p2816_p9 = pneg %p3109_p8  ;;  %s2886_s28 = scalar_lea.hbm %s3409_s0, 512 }
  0x14   : > { %p2887_p12 = scmp.ne.s32.totalorder %s3409_s0, %s2886_s28  ;;  %p2893_p5 = scmp.lt.u32.totalorder %s2886_s28, %s3409_s0 }
  0x15   : > { %p3118_p11 = pnand %p2816_p9, %p3089_p1 }
  0x17   : > { %p2888_p13 = pneg %p3118_p11 }
  0x19   : > { %p2889_p0 = pnand %p2888_p13, %p2887_p12 }
  0x1b   : > { %p2890_p3 = pneg %p2889_p0 }
  0x1d   : > { %p2895_p7 = pnand %p2893_p5, %p2890_p3 }
  0x1f   : > { %2898 = shalt.err (!%p2895_p7)
}
  0x20   : > { %s2899_s5 = scalar_lea.vmem %s126_s23, 512  ;;  %p2907_p4 = scmp.lt.s32.totalorder %s126_s23, %s126_s23 }
  0x21   : > { %p2900_p9 = scmp.ne.s32.totalorder %s126_s23, %s2899_s5  ;;  %p2908_p1 = scmp.lt.s32.totalorder %s2899_s5, %s2899_s5 }
  0x23   : > { %p2902_p10 = pnand %p2900_p9, %p2888_p13  ;;  %p2909_p8 = por %p2908_p1, %p2907_p4 }
  0x25   : > { %p2903_p6 = pneg %p2902_p10 }
  0x27   : > { %p2910_p2 = pnand %p2909_p8, %p2903_p6 }
  0x29   : > { %2913 = shalt.err (!%p2910_p2)
}
  0x2a   : > { %s3033_s6 = smov 128   ;;  %s3034_s7 = smov 8  }
  0x2b   : > { %2819 = dma.hbm_to_vmem [thread:$0]  (!%p3118_p11), %s3409_s0, 512, %s126_s23, [#allocation3], %s3033_s6, %s3033_s6, %s3034_s7  }
  0x2c   : > { %p33_p1 = scmp.ge.s32.totalorder %s31_s25, 2  ;;  %s61_s16 = sadd.s32 1, %s3018_s11 }
  0x2d   : > { %p68_p2 = scmp.ne.s32.totalorder %s3018_s11, %s3014_s10  ;;  %p69_p4 = scmp.eq.s32.totalorder %s3030_s14, 0 }
  0x2e   : > { %s3437_s25 = smov (%p33_p1, %s31_s25), 0  ;;  %p3423_p8 = scmp.ne.s32.totalorder %s3417_s18, 0 }
  0x2f   : > { %p3148_p6 = por %p69_p4, %p68_p2  ;;  %s56_s26 = ssub.s32 %s3026_s13, %s3437_s25 }
  0x30   : > { %p3154_p10 = por %p3423_p8, %p68_p2  ;;  %p2829_p12 = scmp.lt.s32.totalorder %s3030_s14, 2 }
  0x31   : > { %p59_p11 = scmp.eq.s32.totalorder %s56_s26, 0  ;;  %s139_s23 = sand.u32 1, %s3018_s11  }
  0x32   : > { %s2384_s27 = sshll.u32 %s139_s23, 6  ;;  %s2402_s29 = sshll.u32 %s3026_s13, 10 }
  0x33   : > { %s3163_s28 = scalar_select %p59_p11, %s3018_s11, %s61_s16  }
  0x34   : > { %s3169_s4 = scalar_lea.hbm %s3410_s1, %s2402_s29  ;;  %s143_s18 = scalar_lea.vmem [#allocation5], %s2384_s27 }
  0x35   : > { %s152_s5 = sshll.u32 %s143_s18, 4  ;;  %p3175_p13 = pnand %p2829_p12, %p3148_p6  ;;  %s3171_s5 = int_to_ptr.vmem [resolvable:$true] %s152_s5 }
  0x36   : > { %s3179_s15 = scalar_lea.sflag [#allocation6], %s139_s23  ;;  %s2914_s16 = scalar_lea.hbm %s3169_s4, 1024 }
  0x37   : > { %p2915_p0 = scmp.ne.s32.totalorder %s3169_s4, %s2914_s16  ;;  %p2916_p3 = pneg %p3175_p13 }
  0x38   : > { %s2919_s22 = scalar_lea.hbm %s3410_s1, 2048  ;;  %p2920_p9 = scmp.lt.u32.totalorder %s3169_s4, %s3410_s1 }
  0x39   : > { %p2917_p5 = pnand %p2916_p3, %p2915_p0  ;;  %p2921_p1 = scmp.lt.u32.totalorder %s2919_s22, %s2914_s16 }
  0x3a   : > { %p2923_p4 = scmp.lt.u32.totalorder %s2914_s16, %s3169_s4 }
  0x3b   : > { %p2918_p7 = pneg %p2917_p5  ;;  %p2922_p2 = por %p2921_p1, %p2920_p9 }
  0x3d   : > { %p2924_p6 = por %p2923_p4, %p2922_p2 }
  0x3f   : > { %p2925_p8 = pnand %p2924_p6, %p2918_p7 }
  0x41   : > { %2928 = shalt.err (!%p2925_p8)
}
  0x42   : > { %s2929_s23 = scalar_lea.vmem %s3171_s5, 1024  ;;  %s3035_s3 = smov [#allocation5]  }
  0x43   : > { %p2930_p12 = scmp.ne.s32.totalorder %s3171_s5, %s2929_s23  ;;  %s2934_s18 = sshll.u32 %s3035_s3, 4  ;;  %s2935_s18 = int_to_ptr.vmem [resolvable:$false] %s2934_s18 }
  0x44   : > { %s2936_s26 = scalar_lea.vmem %s2935_s18, 2048  ;;  %p2937_p5 = scmp.lt.s32.totalorder %s3171_s5, %s2935_s18 }
  0x45   : > { %p2932_p11 = pnand %p2930_p12, %p2916_p3  ;;  %p2938_p9 = scmp.lt.s32.totalorder %s2936_s26, %s2929_s23 }
  0x47   : > { %p2933_p0 = pneg %p2932_p11  ;;  %p2939_p1 = por %p2938_p9, %p2937_p5 }
  0x49   : > { %p2940_p2 = pnand %p2939_p1, %p2933_p0 }
  0x4b   : > { %2943 = shalt.err (!%p2940_p2)
}
  0x4c   : > { %2823 = dma.hbm_to_vmem [thread:$0]  (!%p3175_p13), %s3169_s4, 1024, %s3171_s5, %s3179_s15, %s3033_s6, %s3033_s6, %s3034_s7  }
  0x4d   : > { %p3426_p3 = scmp.ne.s32.totalorder %s3420_s21, 0 }
  0x4e   : > { %p3427_p7 = scmp.ne.s32.totalorder (!%p3426_p3), %s3416_s17, 0 }
  0x4f   : > { %164 = sbr.rel (%p3426_p3) target bundleno = 540 (0x21c), region = 28 }
  0x56   : > { %2997 = dma.done.wait (%p3427_p7), [#allocation3], 512  }
  0x57   : > { %2999 = vsyncadd (%p3427_p7), [#allocation3], 4294966784  ;;  %s3217_s16 = sand.u32 1, %s3014_s10   ;;  %p3428_p13 = scmp.ne.s32.totalorder %s3418_s19, 0 }
  0x58   : > { %s2389_s8 = sshll.u32 %s3217_s16, 6  ;;  %s171_s27 = scalar_lea.sflag [#allocation6], %s3217_s16 }
  0x59   : > { %s3221_s22 = scalar_lea.vmem [#allocation5], %s2389_s8 }
  0x5a   : > { %3001 = dma.done.wait (%p3428_p13), %s171_s27, 1024  }
  0x5b   : > { %3003 = vsyncadd (%p3428_p13), %s171_s27, 4294966272  ;;  %vm207_vm0 = vcmask 130048   ;;  %v1235_v0 = vld [vmem:[#allocation2 + $0x10] sm:$0xff]  ;;  %v1236_v1 = vld [vmem:[#allocation2 + $0x18] sm:$0xff]  ;;  %s2390_s17 = sshll.u32 %s3217_s16, 4  ;;  %vm1224_vm1 = vcmask 261120  }
  0x5c   : > { %v2395_v2 = vld [vmem:[%s3221_s22 + $0x30] sm:$0xff]  ;;  %v1244_v3 = vand.u32 4294901760, %v1235_v0  ;;  %v1247_v4 = vand.u32 4294901760, %v1236_v1  ;;  %v2396_v6 = vld [vmem:[%s3221_s22 + $0x38] sm:$0xff]  ;;  %v1230_v44 = vld [vmem:[#allocation2] sm:$0xff]  ;;  %s3036_s19 = smov 32  }
  0x5d   : > { %v1238_v5 = vsel %vm207_vm0, %v2395_v2, 0  ;;  %v2391_v7 = vld [vmem:[%s3221_s22 + $0x10] sm:$0xff]  ;;  %v2392_v8 = vld [vmem:[%s3221_s22 + $0x18] sm:$0xff]  ;;  %v1241_v10 = vsel %vm207_vm0, %v2396_v6, 0  ;;  %v1231_v45 = vld [vmem:[#allocation2 + $0x8] sm:$0xff]  ;;  %v1752_v47 = vand.u32 4294901760, %v1230_v44 }
  0x5e   : > { %v3232_v9 = vand.u32 4294901760, %v1238_v5  ;;  %v209_v11 = vsel %vm207_vm0, %v2391_v7, 0  ;;  %v212_v12 = vsel %vm207_vm0, %v2392_v8, 0  ;;  %v3237_v13 = vpack.c.bf16 %v1247_v4, %v1244_v3  ;;  %v2393_v46 = vld [vmem:[%s3221_s22 + $0x20] sm:$0xff]  ;;  %v2394_v53 = vld [vmem:[%s3221_s22 + $0x28] sm:$0xff]  ;;  %s194_s21 = scalar_lea.vmem [#allocation7], %s2390_s17 }
  0x5f   : > { %v3239_v14 = vand.u32 4294901760, %v1241_v10  ;;  %v1332_v15 = vsub.f32 %v1235_v0, %v1244_v3  ;;  %v1339_v16 = vsub.f32 %v1236_v1, %v1247_v4  ;;  %v3242_v18 = vand.u32 4294901760, %v209_v11  ;;  %v197_v50 = vld [vmem:[%s3221_s22] sm:$0xff]  ;;  %v198_v59 = vld [vmem:[%s3221_s22 + $0x8] sm:$0xff]  ;;  %s2403_s6 = sshll.u32 %s3022_s12, 8  ;;  %s2280_s7 = sshll.u32 %s194_s21, 4  ;;  %s3360_s7 = int_to_ptr.vmem [resolvable:$true] %s2280_s7 }
  0x60   : > { %v1311_v17 = vsub.f32 %v1238_v5, %v3232_v9  ;;  %v3244_v19 = vand.u32 4294901760, %v212_v12  ;;  %2717 = vmatprep.subr.bf16.mxu1 %v3237_v13  ;;  %2669 = vmatprep.subr.bf16.mxu0 %v3237_v13  ;;  %v1755_v48 = vand.u32 4294901760, %v1231_v45  ;;  %v1746_v49 = vsel %vm207_vm0, %v2393_v46, 0  ;;  %s3358_s15 = scalar_lea.hbm %s3411_s2, %s2403_s6  ;;  %s2265_s29 = scalar_lea.sflag [#allocation4], %s3217_s16 }
  0x61   : > { %v3248_v20 = vsub.f32 %v1241_v10, %v3239_v14  ;;  %v1333_v21 = vand.u32 4294901760, %v1332_v15  ;;  %v1340_v22 = vand.u32 4294901760, %v1339_v16  ;;  %2719 = vmatpush3.bf16.msra.mxu1 %v3237_v13  ;;  %2671 = vmatpush3.bf16.msra.mxu0 %v3237_v13  ;;  %v282_v24 = vsub.f32 %v209_v11, %v3242_v18  ;;  %s2944_s30 = scalar_lea.vmem %s3360_s7, 256  ;;  %s3037_s12 = smov [#allocation7]  }
  0x62   : > { %v1312_v23 = vand.u32 4294901760, %v1311_v17  ;;  %v3255_v25 = vsub.f32 %v212_v12, %v3244_v19  ;;  %v2724_v40 = vpack.c.bf16 %v1339_v16, %v1332_v15  ;;  %v3274_v51 = vand.u32 4294901760, %v1746_v49  ;;  %p2945_p4 = scmp.ne.s32.totalorder %s3360_s7, %s2944_s30  ;;  %s2948_s23 = sshll.u32 %s3037_s12, 4  ;;  %s2949_s23 = int_to_ptr.vmem [resolvable:$false] %s2948_s23 }
  0x63   : > { %v1322_v26 = vand.u32 4294901760, %v3248_v20  ;;  %v1334_v27 = vsub.f32 %v1332_v15, %v1333_v21  ;;  %v1341_v28 = vsub.f32 %v1339_v16, %v1340_v22  ;;  %v283_v30 = vand.u32 4294901760, %v282_v24  ;;  %s2950_s3 = scalar_lea.vmem %s2949_s23, 512  ;;  %p2951_p12 = scmp.lt.s32.totalorder %s3360_s7, %s2949_s23 }
  0x64   : > { %v1313_v29 = vsub.f32 %v1311_v17, %v1312_v23  ;;  %v293_v31 = vand.u32 4294901760, %v3255_v25  ;;  %v2732_v43 = vpack.c.bf16 %v1340_v22, %v1333_v21  ;;  %v717_v52 = vsel %vm207_vm0, %v197_v50, 0  ;;  %p2946_p6 = pnand %p2945_p4, %p3154_p10  ;;  %p2952_p11 = scmp.lt.s32.totalorder %s2950_s3, %s2944_s30 }
  0x65   : > { %v1323_v32 = vsub.f32 %v3248_v20, %v1322_v26  ;;  %v1335_v33 = vand.u32 4294901760, %v1334_v27  ;;  %v1342_v34 = vand.u32 4294901760, %v1341_v28  ;;  %v284_v36 = vsub.f32 %v282_v24, %v283_v30 }
  0x66   : > { %v1314_v35 = vand.u32 4294901760, %v1313_v29  ;;  %v294_v37 = vsub.f32 %v3255_v25, %v293_v31  ;;  %v3278_v54 = vsub.f32 %v1230_v44, %v1752_v47  ;;  %v3280_v55 = vsub.f32 %v1231_v45, %v1755_v48  ;;  %p2947_p8 = pneg %p2946_p6  ;;  %p2953_p0 = por %p2952_p11, %p2951_p12 }
  0x67   : > { %v1324_v38 = vand.u32 4294901760, %v1323_v32  ;;  %v2720_v39 = vpack.c.bf16 %v1342_v34, %v1335_v33  ;;  %v285_v41 = vand.u32 4294901760, %v284_v36  ;;  %v3282_v56 = vand.u32 4294901760, %v717_v52 }
  0x68   : > { %2588 = vmatprep.mubr.f32.mxu1 %v1314_v35  ;;  %v295_v42 = vand.u32 4294901760, %v294_v37  ;;  %v3286_v57 = vsub.f32 %v1746_v49, %v3274_v51  ;;  %v1749_v58 = vsel %vm207_vm0, %v2394_v53, 0  ;;  %v1841_v60 = vand.u32 4294901760, %v3278_v54  ;;  %p2954_p5 = pnand %p2953_p0, %p2947_p8 }
  0x69   : > { %2589 = vmatmul.mubr.f32.vlgmr.msra.gmra.mrb[0].mxu1 %v1324_v38  ;;  %2721 = vmatprep.subr.bf16.mxu1 %v2720_v39  ;;  %v1848_v61 = vand.u32 4294901760, %v3280_v55  ;;  %v3293_v62 = vand.u32 4294901760, %v1749_v58  ;;  %v3297_v63 = vsub.f32 %v717_v52, %v3282_v56  ;;  %v720_v0 = vsel %vm207_vm0, %v198_v59, 0 }
  0x6a   : > { %2723 = vmatpush3.bf16.msra.mxu1 %v2720_v39  ;;  %2595 = vmatprep.mubr.f32.mxu1 %v3232_v9  ;;  %v1820_v1 = vand.u32 4294901760, %v3286_v57  ;;  %v3302_v2 = vpack.c.bf16 %v1755_v48, %v1752_v47  ;;  %v1842_v3 = vsub.f32 %v3278_v54, %v1841_v60  ;;  %v3308_v5 = vand.u32 4294901760, %v720_v0 }
  0x6b   : > { %2725 = vmatprep.subr.bf16.mxu1 %v2724_v40  ;;  %2504 = vmatprep.mubr.f32.mxu0 %v285_v41  ;;  %v1849_v4 = vsub.f32 %v3280_v55, %v1848_v61  ;;  %v1829_v6 = vsub.f32 %v1749_v58, %v3293_v62  ;;  %v791_v7 = vand.u32 4294901760, %v3297_v63  ;;  %vm2261_vm2 = vcmask 523520  }
  0x6c   : > { %2505 = vmatmul.mubr.f32.vlgmr.msra.gmra.mrb[0].mxu0 %v295_v42  ;;  %2673 = vmatprep.subr.bf16.mxu0 %v2720_v39  ;;  %v1821_v8 = vsub.f32 %v3286_v57, %v1820_v1  ;;  %v1843_v10 = vand.u32 4294901760, %v1842_v3  ;;  %v800_v12 = vsub.f32 %v720_v0, %v3308_v5 }
  0x6d   : > { %2675 = vmatpush3.bf16.msra.mxu0 %v2720_v39  ;;  %2511 = vmatprep.mubr.f32.mxu0 %v3242_v18  ;;  %v1850_v11 = vand.u32 4294901760, %v1849_v4  ;;  %v1830_v15 = vand.u32 4294901760, %v1829_v6  ;;  %v792_v16 = vsub.f32 %v3297_v63, %v791_v7 }
  0x6e   : > { %2677 = vmatprep.subr.bf16.mxu0 %v2724_v40 }
  0x6f   : > { %v1831_v21 = vsub.f32 %v1829_v6, %v1830_v15  ;;  %v793_v22 = vand.u32 4294901760, %v792_v16 }
  0x71   : > { %2596 = vmatmul.mubr.f32.vlgmr.msra.gmra.mrb[0].mxu1 %v3239_v14 }
  0x72   : > { %2727 = vmatpush3.bf16.msra.mxu1 %v2724_v40  ;;  %2602 = vmatprep.mubr.f32.mxu1 %v1311_v17  ;;  %v1822_v17 = vand.u32 4294901760, %v1821_v8 }
  0x73   : > { %2729 = vmatprep.subr.bf16.mxu1 %v3237_v13 }
  0x74   : > { %2512 = vmatmul.mubr.f32.vlgmr.msra.gmra.mrb[0].mxu0 %v3244_v19 }
  0x75   : > { %2679 = vmatpush3.bf16.msra.mxu0 %v2724_v40  ;;  %2518 = vmatprep.mubr.f32.mxu0 %v282_v24 }
  0x76   : > { %2681 = vmatprep.subr.bf16.mxu0 %v3237_v13 }
  0x79   : > { %2603 = vmatmul.mubr.f32.vlgmr.msra.gmra.mrb[0].mxu1 %v3248_v20  ;;  %v801_v20 = vand.u32 4294901760, %v800_v12 }
  0x7a   : > { %2731 = vmatpush3.bf16.msra.mxu1 %v3237_v13  ;;  %2609 = vmatprep.mubr.f32.mxu1 %v1312_v23  ;;  %v1832_v23 = vand.u32 4294901760, %v1831_v21 }
  0x7b   : > { %2733 = vmatprep.subr.bf16.mxu1 %v2732_v43 }
  0x7c   : > { %2519 = vmatmul.mubr.f32.vlgmr.msra.gmra.mrb[0].mxu0 %v3255_v25 }
  0x7d   : > { %2683 = vmatpush3.bf16.msra.mxu0 %v3237_v13  ;;  %2525 = vmatprep.mubr.f32.mxu0 %v283_v30 }
  0x7e   : > { %2685 = vmatprep.subr.bf16.mxu0 %v2732_v43 }
  0x81   : > { %2610 = vmatmul.mubr.f32.vlgmr.msra.gmra.mrb[0].mxu1 %v1322_v26 }
  0x82   : > { %2735 = vmatpush3.bf16.msra.mxu1 %v2732_v43  ;;  %2616 = vmatprep.mubr.f32.mxu1 %v3232_v9 }
  0x83   : > { %2737 = vmatprep.subr.bf16.mxu1 %v3237_v13 }
  0x84   : > { %2526 = vmatmul.mubr.f32.vlgmr.msra.gmra.mrb[0].mxu0 %v293_v31 }
  0x85   : > { %2687 = vmatpush3.bf16.msra.mxu0 %v2732_v43  ;;  %2532 = vmatprep.mubr.f32.mxu0 %v3242_v18 }
  0x86   : > { %2689 = vmatprep.subr.bf16.mxu0 %v3237_v13 }
  0x89   : > { %2617 = vmatmul.mubr.f32.vlgmr.msra.gmra.mrb[0].mxu1 %v3239_v14 }
  0x8a   : > { %2739 = vmatpush3.bf16.msra.mxu1 %v3237_v13  ;;  %2623 = vmatprep.mubr.f32.mxu1 %v3232_v9  ;;  %v2744_v9 = vpack.c.bf16 %v1850_v11, %v1843_v10 }
  0x8b   : > { %2741 = vmatprep.subr.bf16.mxu1 %v3302_v2 }
  0x8c   : > { %2533 = vmatmul.mubr.f32.vlgmr.msra.gmra.mrb[0].mxu0 %v3244_v19 }
  0x8d   : > { %2691 = vmatpush3.bf16.msra.mxu0 %v3237_v13  ;;  %2539 = vmatprep.mubr.f32.mxu0 %v3242_v18  ;;  %v802_v13 = vsub.f32 %v800_v12, %v801_v20  ;;  %v2748_v18 = vpack.c.bf16 %v3280_v55, %v3278_v54 }
  0x8e   : > { %2693 = vmatprep.subr.bf16.mxu0 %v3302_v2 }
  0x8f   : > { %v803_v24 = vand.u32 4294901760, %v802_v13 }
  0x91   : > { %2624 = vmatmul.mubr.f32.vlgmr.msra.gmra.mrb[0].mxu1 %v3239_v14  ;;  %v2756_v14 = vpack.c.bf16 %v1848_v61, %v1841_v60 }
  0x92   : > { %2743 = vmatpush3.bf16.msra.mxu1 %v3302_v2  ;;  %2630 = vmatprep.mubr.f32.mxu1 %v1822_v17 }
  0x93   : > { %2745 = vmatprep.subr.bf16.mxu1 %v2744_v9 }
  0x94   : > { %2540 = vmatmul.mubr.f32.vlgmr.msra.gmra.mrb[0].mxu0 %v3244_v19 }
  0x95   : > { %2695 = vmatpush3.bf16.msra.mxu0 %v3302_v2  ;;  %2546 = vmatprep.mubr.f32.mxu0 %v793_v22 }
  0x96   : > { %2697 = vmatprep.subr.bf16.mxu0 %v2744_v9 }
  0x99   : > { %2631 = vmatmul.mubr.f32.vlgmr.msra.gmra.mrb[0].mxu1 %v1832_v23 }
  0x9a   : > { %2747 = vmatpush3.bf16.msra.mxu1 %v2744_v9  ;;  %2637 = vmatprep.mubr.f32.mxu1 %v3274_v51 }
  0x9b   : > { %2749 = vmatprep.subr.bf16.mxu1 %v2748_v18 }
  0x9c   : > { %2547 = vmatmul.mubr.f32.vlgmr.msra.gmra.mrb[0].mxu0 %v803_v24 }
  0x9d   : > { %2699 = vmatpush3.bf16.msra.mxu0 %v2744_v9  ;;  %2553 = vmatprep.mubr.f32.mxu0 %v3282_v56 }
  0x9e   : > { %2701 = vmatprep.subr.bf16.mxu0 %v2748_v18 }
  0xa1   : > { %2638 = vmatmul.mubr.f32.vlgmr.msra.gmra.mrb[0].mxu1 %v3293_v62 }
  0xa2   : > { %2751 = vmatpush3.bf16.msra.mxu1 %v2748_v18  ;;  %2644 = vmatprep.mubr.f32.mxu1 %v3286_v57 }
  0xa3   : > { %2753 = vmatprep.subr.bf16.mxu1 %v3302_v2 }
  0xa4   : > { %2554 = vmatmul.mubr.f32.vlgmr.msra.gmra.mrb[0].mxu0 %v3308_v5 }
  0xa5   : > { %2703 = vmatpush3.bf16.msra.mxu0 %v2748_v18  ;;  %2560 = vmatprep.mubr.f32.mxu0 %v3297_v63 }
  0xa6   : > { %2705 = vmatprep.subr.bf16.mxu0 %v3302_v2 }
  0xa9   : > { %2645 = vmatmul.mubr.f32.vlgmr.msra.gmra.mrb[0].mxu1 %v1829_v6 }
  0xaa   : > { %2755 = vmatpush3.bf16.msra.mxu1 %v3302_v2  ;;  %2651 = vmatprep.mubr.f32.mxu1 %v1820_v1 }
  0xab   : > { %2757 = vmatprep.subr.bf16.mxu1 %v2756_v14 }
  0xac   : > { %2561 = vmatmul.mubr.f32.vlgmr.msra.gmra.mrb[0].mxu0 %v800_v12 }
  0xad   : > { %2707 = vmatpush3.bf16.msra.mxu0 %v3302_v2  ;;  %2567 = vmatprep.mubr.f32.mxu0 %v791_v7 }
  0xae   : > { %2709 = vmatprep.subr.bf16.mxu0 %v2756_v14 }
  0xb1   : > { %2652 = vmatmul.mubr.f32.vlgmr.msra.gmra.mrb[0].mxu1 %v1830_v15 }
  0xb2   : > { %2759 = vmatpush3.bf16.msra.mxu1 %v2756_v14  ;;  %2658 = vmatprep.mubr.f32.mxu1 %v3274_v51 }
  0xb3   : > { %2761 = vmatprep.subr.bf16.mxu1 %v3302_v2 }
  0xb4   : > { %2568 = vmatmul.mubr.f32.vlgmr.msra.gmra.mrb[0].mxu0 %v801_v20 }
  0xb5   : > { %2711 = vmatpush3.bf16.msra.mxu0 %v2756_v14  ;;  %2574 = vmatprep.mubr.f32.mxu0 %v3282_v56 }
  0xb6   : > { %2713 = vmatprep.subr.bf16.mxu0 %v3302_v2 }
  0xb9   : > { %2659 = vmatmul.mubr.f32.vlgmr.msra.gmra.mrb[0].mxu1 %v3293_v62 }
  0xba   : > { %2763 = vmatpush3.bf16.msra.mxu1 %v3302_v2  ;;  %2665 = vmatprep.mubr.f32.mxu1 %v3274_v51 }
  0xbc   : > { %2575 = vmatmul.mubr.f32.vlgmr.msra.gmra.mrb[0].mxu0 %v3308_v5 }
  0xbd   : > { %2715 = vmatpush3.bf16.msra.mxu0 %v3302_v2  ;;  %2581 = vmatprep.mubr.f32.mxu0 %v3282_v56 }
  0xc1   : > { %2666 = vmatmul.mubr.f32.vlgmr.msra.gmra.mrb[0].mxu1 %v3293_v62 }
  0xc4   : > { %2582 = vmatmul.mubr.f32.vlgmr.msra.gmra.mrb[0].mxu0 %v3308_v5 }
 0x194   : > { %v2667_v19 = vpop.f32.mrb[0].mxu1 }
 0x195   : > { %v2243_v25 = vpop.f32.mrb[1].mxu1 }
 0x196   : > { %2255 = vrot.lane.b32.xlu0 %v2243_v25, %s3036_s19 }
 0x197   : > { %v2583_v26 = vpop.f32.mrb[0].mxu0 }
 0x198   : > { %1226 = vst.msk [vmem:[%s194_s21 + $0x8] sm:$0xff] %vm1224_vm1, %v2583_v26  ;;  %v1214_v27 = vpop.f32.mrb[1].mxu0 }
 0x199   : > { %1225 = vst.msk [vmem:[%s194_s21] sm:$0xff] %vm1224_vm1, %v1214_v27 }
 0x19a   : > { %2257 = vrot.lane.b32.xlu0 %v2667_v19, %s3036_s19 }
 0x208   : > { %v2256_v28 = vpop.permute.xlu0 %2255 }
 0x209   : > { %2262 = vst.msk [vmem:[%s194_s21] sm:$0xff] %vm2261_vm2, %v2256_v28 }
 0x20c   : > { %v2258_v29 = vpop.permute.xlu0 %2257 }
 0x20d   : > { %2263 = vst.msk [vmem:[%s194_s21 + $0x8] sm:$0xff] %vm2261_vm2, %v2258_v29 }
 0x20e   : > { %2957 = shalt.err (!%p2954_p5)
}
 0x20f   : > { %s2958_s18 = scalar_lea.hbm %s3358_s15, 256  ;;  %s2962_s27 = scalar_lea.hbm %s3411_s2, 512 }
 0x210   : > { %p2959_p9 = scmp.ne.s32.totalorder %s3358_s15, %s2958_s18  ;;  %p2963_p3 = scmp.lt.u32.totalorder %s3358_s15, %s3411_s2 }
 0x211   : > { %p2964_p7 = scmp.lt.u32.totalorder %s2962_s27, %s2958_s18  ;;  %p2966_p4 = scmp.lt.u32.totalorder %s2958_s18, %s3358_s15 }
 0x212   : > { %p2960_p1 = pnand %p2959_p9, %p3154_p10 }
 0x213   : > { %p2965_p13 = por %p2964_p7, %p2963_p3 }
 0x214   : > { %p2961_p2 = pneg %p2960_p1 }
 0x215   : > { %p2967_p6 = por %p2966_p4, %p2965_p13 }
 0x217   : > { %p2968_p8 = pnand %p2967_p6, %p2961_p2 }
 0x219   : > { %2971 = shalt.err (!%p2968_p8)
}
 0x21a   : > { %s3038_s19 = smov 128   ;;  %s3039_s21 = smov 8  }
 0x21b   : > { %2814 = dma.vmem_to_hbm [thread:$0]  (%p3154_p10), %s3360_s7, 256, %s3358_s15, %s2265_s29, %s3038_s19, %s3038_s19, %s3039_s21  }
 0x21c PF: > { %s2295_s6 = sand.u32 1, %s3010_s9   ;;  %p3429_p12 = scmp.ne.s32.totalorder %s3419_s20, 0 }
 0x21d   : > { %p3430_p11 = scmp.ge.s32.totalorder %s3030_s14, 2  ;;  %s2296_s4 = scalar_lea.sflag [#allocation4], %s2295_s6 }
 0x21f   : > { %p2825_p0 = pnand %p3430_p11, %p3429_p12 }
 0x221   : > { %3005 = dma.done.wait (!%p2825_p0), %s2296_s4, 256  }
 0x222   : > { %3007 = vsyncadd (!%p2825_p0), %s2296_s4, 4294967040  ;;  %s19_s14 = sadd.s32 1, %s3030_s14   ;;  %s3431_s9 = smov %s3014_s10 }
 0x223   : > { %p16_p5 = scmp.ge.s32.totalorder %s19_s14, 4   ;;  %s3432_s10 = smov %s3018_s11 }
 0x224   : > { %s3433_s11 = smov %s3163_s28  ;;  %s3434_s12 = smov %s3026_s13 }
 0x225   : > { %s3435_s13 = smov %s3437_s25  ;;  %18 = sbr.rel (!%p16_p5) target bundleno = 7 (0x7), region = 82 }
 0x22c   :  { %2301 = vsyncpa [#allocation3], 1 }
 0x22d   :  { %2303 = vsyncpa [#allocation3 + $0x1], 1 }
 0x22e   :  { %2304 = vsyncpa [#allocation6], 1 }
 0x22f   :  { %2306 = vsyncpa [#allocation6 + $0x1], 1 }
 0x230   :  { %2307 = vsyncpa [#allocation4], 1 }
 0x231   :  { %2309 = vsyncpa [#allocation4 + $0x1], 1 }

</bundles_post_ra>
